<compile_context>
chip_gen: v5e
topology: v5e:2x2
jax: 0.10.0
libtpu: 0.0.40
codegen_flags: <defaults>
</compile_context>

<pallas_src>
import numpy as np
import jax
import jax.numpy as jnp
from jax.experimental import pallas as pl
from jax.experimental.pallas import tpu as pltpu

INPUT_SIZE = 1024
HIDDEN = 256
NUM_LAYERS = 2


# ------------------- 1) hoisted layer-0 input projection ---------------------
def _input_proj_kernel(x_ref, w_ref, b_ref, o_ref):
    # x_ref: (1, Tt, D) f32   w_ref: (D, 3H) bf16   b_ref: (1, 3H) f32
    # o_ref: (Tt, 3H) bf16  (time-major; the batch index selects the column block)
    x = x_ref[0].astype(jnp.bfloat16)
    o_ref[...] = (jnp.dot(x, w_ref[...], preferred_element_type=jnp.float32)
                  + b_ref[...]).astype(o_ref.dtype)


def input_projection(x, wih_t_bf16, bias_f32, b_pad):
    """x: (B, T, D) f32 -> gi0: (T, Bp*3H) bf16 (time-major, bias folded in).

    Only columns of the B real batch entries are written.  Columns of padded
    batch slots stay uninitialized; they only ever feed padded rows downstream
    which are sliced away before the final result (batch rows never mix)."""
    B, T, D = x.shape
    G = wih_t_bf16.shape[1]                      # 3H
    Tt = T if T <= 512 else 512                  # HBM-bound -> big time tiles
    nt = pl.cdiv(T, Tt)
    return pl.pallas_call(
        _input_proj_kernel,
        out_shape=jax.ShapeDtypeStruct((T, b_pad * G), jnp.bfloat16),
        grid_spec=pltpu.PrefetchScalarGridSpec(
            num_scalar_prefetch=0,
            grid=(B, nt),
            in_specs=[
                pl.BlockSpec((1, Tt, D), lambda b, t: (b, t, 0)),
                pl.BlockSpec((D, G), lambda b, t: (0, 0)),
                pl.BlockSpec((1, G), lambda b, t: (0, 0)),
            ],
            out_specs=pl.BlockSpec((Tt, G), lambda b, t: (t, b)),
        ),
        compiler_params=pltpu.CompilerParams(
            dimension_semantics=("parallel", "parallel"),
            vmem_limit_bytes=24 * 1024 * 1024),
    )(x, wih_t_bf16, bias_f32)


# --------------------- 2) fused 2-layer GRU recurrence -----------------------
def _gru2_kernel(gi0_ref, whh0_ref, bhn0_ref, wih1_ref, bi1_ref, whh1_ref,
                 bhn1_ref, out_ref, h0_ref, h1_ref, h0c_ref, gi1_ref):
    # gi0_ref: (Tc*Bp, 3H) bf16 (time-major slabs of Bp rows per step)
    # out_ref: (Tc*Bp, H) bf16
    # h0_ref/h1_ref: (Bp, H) f32 persistent hidden states
    # h0c_ref: (Tc*Bp, H) f32  per-chunk layer-0 outputs
    # gi1_ref: (Tc*Bp, 3H) f32 per-chunk layer-1 input gates
    Bp, H = h0_ref.shape
    Tc = h0c_ref.shape[0] // Bp

    @pl.when(pl.program_id(0) == 0)
    def _():
        h0_ref[...] = jnp.zeros_like(h0_ref)
        h1_ref[...] = jnp.zeros_like(h1_ref)

    bhn0 = bhn0_ref[...]          # (1, H)  f32
    bi1 = bi1_ref[...]            # (1, 3H) f32 (b_ih1 + r/z part of b_hh1)
    bhn1 = bhn1_ref[...]          # (1, H)  f32

    # -------- phase 1: layer-0 recurrence; park h0[t] in VMEM scratch --------
    def l0_step(i, carry):
        off = pl.multiple_of(i * Bp, Bp)
        gi0 = gi0_ref[pl.ds(off, Bp), :].astype(jnp.float32)      # (Bp, 3H)
        h0 = h0_ref[...]
        gh0 = jnp.dot(h0.astype(jnp.bfloat16), whh0_ref[...],
                      preferred_element_type=jnp.float32)
        r = jax.nn.sigmoid(gi0[:, :H] + gh0[:, :H])
        z = jax.nn.sigmoid(gi0[:, H:2 * H] + gh0[:, H:2 * H])
        n = jnp.tanh(gi0[:, 2 * H:] + r * (gh0[:, 2 * H:] + bhn0))
        h0n = (1.0 - z) * n + z * h0
        h0_ref[...] = h0n
        h0c_ref[pl.ds(off, Bp), :] = h0n
        return carry

    jax.lax.fori_loop(0, Tc, l0_step, 0, unroll=8)

    # -------- phase 2: layer-1 input projection = ONE chunk-level matmul -----
    gi1_ref[...] = jnp.dot(h0c_ref[...].astype(jnp.bfloat16), wih1_ref[...],
                           preferred_element_type=jnp.float32)

    # -------- phase 3: layer-1 recurrence (only gh1 left on the serial path) -
    def l1_step(i, carry):
        off = pl.multiple_of(i * Bp, Bp)
        gi1 = gi1_ref[pl.ds(off, Bp), :] + bi1                    # (Bp, 3H)
        h1 = h1_ref[...]
        gh1 = jnp.dot(h1.astype(jnp.bfloat16), whh1_ref[...],
                      preferred_element_type=jnp.float32)
        r = jax.nn.sigmoid(gi1[:, :H] + gh1[:, :H])
        z = jax.nn.sigmoid(gi1[:, H:2 * H] + gh1[:, H:2 * H])
        n = jnp.tanh(gi1[:, 2 * H:] + r * (gh1[:, 2 * H:] + bhn1))
        h1n = (1.0 - z) * n + z * h1
        h1_ref[...] = h1n
        out_ref[pl.ds(off, Bp), :] = h1n.astype(out_ref.dtype)
        return carry

    jax.lax.fori_loop(0, Tc, l1_step, 0, unroll=8)


def gru2(gi0_flat, T, Bp, whh0_t, bhn0, wih1_t, bi1, whh1_t, bhn1):
    """gi0_flat: (T*Bp, 3H) bf16 (time-major) -> h1: (T*Bp, H) bf16 (time-major)."""
    G = gi0_flat.shape[1]
    H = whh0_t.shape[0]
    Tc = T if T <= 64 else 64                    # 64 % 8 == 0; else full dim
    nc = pl.cdiv(T, Tc)
    # NOTE: when T % Tc != 0 the final chunk's padded steps (after all valid
    # steps) update h0/h1 with unspecified values; that is safe because it is
    # the last chunk and those rows of out_ref are dropped by Pallas.
    return pl.pallas_call(
        _gru2_kernel,
        out_shape=jax.ShapeDtypeStruct((T * Bp, H), jnp.bfloat16),
        grid_spec=pltpu.PrefetchScalarGridSpec(
            num_scalar_prefetch=0,
            grid=(nc,),
            in_specs=[
                pl.BlockSpec((Tc * Bp, G), lambda c: (c, 0)),
                pl.BlockSpec((H, G), lambda c: (0, 0)),
                pl.BlockSpec((1, H), lambda c: (0, 0)),
                pl.BlockSpec((H, G), lambda c: (0, 0)),
                pl.BlockSpec((1, G), lambda c: (0, 0)),
                pl.BlockSpec((H, G), lambda c: (0, 0)),
                pl.BlockSpec((1, H), lambda c: (0, 0)),
            ],
            out_specs=pl.BlockSpec((Tc * Bp, H), lambda c: (c, 0)),
            scratch_shapes=[pltpu.VMEM((Bp, H), jnp.float32),        # h0 state
                            pltpu.VMEM((Bp, H), jnp.float32),        # h1 state
                            pltpu.VMEM((Tc * Bp, H), jnp.float32),   # h0 chunk
                            pltpu.VMEM((Tc * Bp, G), jnp.float32)],  # gi1 chunk
        ),
        compiler_params=pltpu.CompilerParams(
            dimension_semantics=("arbitrary",),        # sequential recurrence
            vmem_limit_bytes=24 * 1024 * 1024),        # ~11 MiB live, v7x-safe
    )(gi0_flat, whh0_t, bhn0, wih1_t, bi1, whh1_t, bhn1)


# ------------------ 3) linear interpolation as a T-contraction ---------------
def _interp_kernel(h_ref, w_ref, o_ref, acc_ref):
    # h_ref: (TK, TM) bf16   w_ref: (TK, Fp) bf16   o_ref/acc_ref: (TM, Fp) f32
    @pl.when(pl.program_id(1) == 0)
    def _():
        acc_ref[...] = jnp.zeros_like(acc_ref)
    acc_ref[...] += jax.lax.dot_general(
        h_ref[...], w_ref[...],
        dimension_numbers=(((0,), (0,)), ((), ())),
        preferred_element_type=jnp.float32)
    @pl.when(pl.program_id(1) == pl.num_programs(1) - 1)
    def _():
        o_ref[...] = acc_ref[...].astype(o_ref.dtype)


def interp_matmul(h2d_bf16, w_bf16, m_real):
    """h2d: (T, M_pad) bf16, contract over T against w: (T, Fp) -> (m_real, Fp) f32.

    Only the first m_real (= B*H) columns of h2d are read (padded-batch columns
    are never touched).  M is tiled by 256, T by 512 when it divides evenly."""
    T = h2d_bf16.shape[0]
    Fp = w_bf16.shape[1]
    TM = 256 if m_real % 256 == 0 else m_real    # m_real = B*256 -> always 256
    TK = 512 if T % 512 == 0 else T              # only tile T when it divides
    nm, nk = m_real // TM, T // TK
    return pl.pallas_call(
        _interp_kernel,
        out_shape=jax.ShapeDtypeStruct((m_real, Fp), jnp.float32),
        grid_spec=pltpu.PrefetchScalarGridSpec(
            num_scalar_prefetch=0,
            grid=(nm, nk),
            in_specs=[pl.BlockSpec((TK, TM), lambda m, k: (k, m)),
                      pl.BlockSpec((TK, Fp), lambda m, k: (k, 0))],
            out_specs=pl.BlockSpec((TM, Fp), lambda m, k: (m, 0)),
            scratch_shapes=[pltpu.VMEM((TM, Fp), jnp.float32)],
        ),
        compiler_params=pltpu.CompilerParams(
            dimension_semantics=("parallel", "arbitrary"),
            vmem_limit_bytes=24 * 1024 * 1024),
    )(h2d_bf16, w_bf16)


def linear_interp_matrix(t_in, t_out, t_pad=None):
    """W (t_in, t_pad) s.t. out[..., j] = sum_t in[..., t] * W[t, j], matching
    F.interpolate(mode='linear', align_corners=False). Columns >= t_out are 0."""
    t_pad = t_out if t_pad is None else t_pad
    W = np.zeros((t_in, t_pad), np.float32)
    scale = t_in / t_out
    for j in range(t_out):
        src = max((j + 0.5) * scale - 0.5, 0.0)
        i0 = min(int(np.floor(src)), t_in - 1)
        i1 = min(i0 + 1, t_in - 1)
        lam = src - i0
        W[i0, j] += 1.0 - lam
        W[i1, j] += lam
    return jnp.asarray(W)


# ------------------------------- full forward --------------------------------
def deepspeech_score_encoder(x, num_frames, params):
    """x: (B, T, 1024) f32 -> (B, 256, num_frames) f32."""
    B, T, _ = x.shape
    H = HIDDEN
    bf16 = jnp.bfloat16
    (wih0, whh0, bih0, bhh0), (wih1, whh1, bih1, bhh1) = params
    Bp = ((B + 7) // 8) * 8                      # pad batch to the sublane tile

    # Fold b_ih and the r/z portion of b_hh into the per-layer input gates;
    # only the n-gate hidden bias stays inside the recurrence (PyTorch semantics).
    zeros_h = jnp.zeros((H,), jnp.float32)
    bi0 = (bih0 + jnp.concatenate([bhh0[:2 * H], zeros_h])).reshape(1, 3 * H)
    bhn0 = bhh0[2 * H:].reshape(1, H)
    bi1 = (bih1 + jnp.concatenate([bhh1[:2 * H], zeros_h])).reshape(1, 3 * H)
    bhn1 = bhh1[2 * H:].reshape(1, H)

    # 1) layer-0 input projection for the whole sequence (time-major bf16 output,
    #    no swapaxes/transpose of x or gi0 anywhere).
    gi0 = input_projection(x, wih0.T.astype(bf16), bi0, Bp)      # (T, Bp*3H) bf16
    gi0 = gi0.reshape(T * Bp, 3 * H)                             # free reshape

    # 2) fused 2-layer recurrence (hidden states carried in f32 VMEM scratch,
    #    layer-1 input projection hoisted to one chunk-level matmul).
    h = gru2(gi0, T, Bp, whh0.T.astype(bf16), bhn0,
             wih1.T.astype(bf16), bi1, whh1.T.astype(bf16), bhn1)  # (T*Bp, H) bf16

    # 3) F.interpolate(linear) == matmul over T against the interpolation matrix,
    #    contracted directly on the time-major output; frame axis padded to a
    #    multiple of 128 for lane-dense stores, padded batch columns skipped.
    f_pad = max(128, ((num_frames + 127) // 128) * 128)
    W = linear_interp_matrix(T, num_frames, f_pad).astype(bf16)  # (T, f_pad)
    out = interp_matmul(h.reshape(T, Bp * H), W, B * H)          # (B*H, f_pad) f32
    return out.reshape(B, H, f_pad)[:, :, :num_frames]


# ----------------------------- deterministic init ----------------------------
def init_params(key):
    params = []
    bound = 1.0 / np.sqrt(HIDDEN)
    for layer in range(NUM_LAYERS):
        d_in = INPUT_SIZE if layer == 0 else HIDDEN
        key, k1, k2, k3, k4 = jax.random.split(key, 5)
        wih = jax.random.uniform(k1, (3 * HIDDEN, d_in), jnp.float32, -bound, bound)
        whh = jax.random.uniform(k2, (3 * HIDDEN, HIDDEN), jnp.float32, -bound, bound)
        bih = jax.random.uniform(k3, (3 * HIDDEN,), jnp.float32, -bound, bound)
        bhh = jax.random.uniform(k4, (3 * HIDDEN,), jnp.float32, -bound, bound)
        params.append((wih, whh, bih, bhh))
    return params


# ------------------------------ pure-JAX reference ---------------------------
def ref_forward(x, num_frames, params):
    B, T, _ = x.shape
    h = x
    for (wih, whh, bih, bhh) in params:
        def step(hprev, xt):
            gi = xt @ wih.T + bih
            gh = hprev @ whh.T + bhh
            r = jax.nn.sigmoid(gi[:, :HIDDEN] + gh[:, :HIDDEN])
            z = jax.nn.sigmoid(gi[:, HIDDEN:2 * HIDDEN] + gh[:, HIDDEN:2 * HIDDEN])
            n = jnp.tanh(gi[:, 2 * HIDDEN:] + r * gh[:, 2 * HIDDEN:])
            hnew = (1.0 - z) * n + z * hprev
            return hnew, hnew
        h0 = jnp.zeros((B, HIDDEN), jnp.float32)
        _, ys = jax.lax.scan(step, h0, jnp.swapaxes(h, 0, 1))
        h = jnp.swapaxes(ys, 0, 1)  # (B, T, H)
    W = linear_interp_matrix(T, num_frames)
    return jnp.einsum('bth,tf->bhf', h, W)


if __name__ == "__main__":
    B, T, num_frames = 2, 8, 16
    x = jax.random.normal(jax.random.PRNGKey(0), (B, T, INPUT_SIZE), jnp.float32)
    params = init_params(jax.random.PRNGKey(42))

    out = jax.block_until_ready(deepspeech_score_encoder(x, num_frames, params))
    assert out.shape == (B, HIDDEN, num_frames), out.shape

    ref = ref_forward(x, num_frames, params)
    # bf16 MXU operands / bf16 gi0 staging with f32 accumulation & f32 gate math,
    # compared against a pure-f32 reference.
    np.testing.assert_allclose(np.asarray(out), np.asarray(ref), atol=5e-2, rtol=5e-2)
    print("KERNEL_OK")
</pallas_src>

<mosaic_0001>
module attributes {stable_mosaic.version = 11 : i64} {
  func.func @_input_proj_kernel(%arg0: i32, %arg1: i32, %arg2: memref<1x8x1024xf32, #tpu.memory_space<vmem>>, %arg3: memref<1024x768xbf16, #tpu.memory_space<vmem>>, %arg4: memref<1x768xf32, #tpu.memory_space<vmem>>, %arg5: memref<8x768xbf16, #tpu.memory_space<vmem>>) attributes {dimension_semantics = [#tpu.dimension_semantics<parallel>, #tpu.dimension_semantics<parallel>], iteration_bounds = array<i64: 2, 1>, scalar_prefetch = 0 : i64, scratch_operands = 0 : i64, tpu.core_type = #tpu.core_type<tc>, window_params = [{transform_indices = @transform_0, window_bounds = array<i64: 1, 8, 1024>}, {pipeline_mode = #tpu.pipeline_mode<synchronous>, transform_indices = @transform_1, window_bounds = array<i64: 1024, 768>}, {pipeline_mode = #tpu.pipeline_mode<synchronous>, transform_indices = @transform_2, window_bounds = array<i64: 1, 768>}, {transform_indices = @transform_3, window_bounds = array<i64: 8, 768>}]} {
    %c0 = arith.constant 0 : index
    %c0_0 = arith.constant 0 : index
    %c0_1 = arith.constant 0 : index
    %0 = vector.load %arg2[%c0, %c0_0, %c0_1] : memref<1x8x1024xf32, #tpu.memory_space<vmem>>, vector<1x8x1024xf32>
    %1 = vector.shape_cast %0 : vector<1x8x1024xf32> to vector<8x1024xf32>
    %2 = arith.truncf %1 : vector<8x1024xf32> to vector<8x1024xbf16>
    %c0_2 = arith.constant 0 : index
    %c0_3 = arith.constant 0 : index
    %3 = vector.load %arg3[%c0_2, %c0_3] : memref<1024x768xbf16, #tpu.memory_space<vmem>>, vector<1024x768xbf16>
    %cst = arith.constant dense<0.000000e+00> : vector<8x768xf32>
    %4 = tpu.matmul %2, %3, %cst {dimension_numbers = #tpu.dot_dimension_numbers<[1], [0], [0], [1], [0, 0, 1, 1], [], []>} : vector<8x1024xbf16>, vector<1024x768xbf16>, vector<8x768xf32> -> vector<8x768xf32>
    %c0_4 = arith.constant 0 : index
    %c0_5 = arith.constant 0 : index
    %5 = vector.load %arg4[%c0_4, %c0_5] : memref<1x768xf32, #tpu.memory_space<vmem>>, vector<1x768xf32>
    %6 = vector.broadcast %5 : vector<1x768xf32> to vector<8x768xf32>
    %7 = arith.addf %4, %6 : vector<8x768xf32>
    %8 = arith.truncf %7 : vector<8x768xf32> to vector<8x768xbf16>
    %c0_6 = arith.constant 0 : index
    %c0_7 = arith.constant 0 : index
    %9 = vector.load %arg5[%c0_6, %c0_7] : memref<8x768xbf16, #tpu.memory_space<vmem>>, vector<8x768xbf16>
    tpu.vector_store %arg5[%c0_6, %c0_7], %8 {strides = array<i32>} : memref<8x768xbf16, #tpu.memory_space<vmem>>, vector<8x768xbf16>,
    return
  }
  func.func @transform_0(%arg0: i32, %arg1: i32) -> (i32, i32, i32) {
    %c0_i32 = arith.constant 0 : i32
    %c0_i32_0 = arith.constant 0 : i32
    return %arg0, %arg1, %c0_i32 : i32, i32, i32
  }
  func.func @transform_1(%arg0: i32, %arg1: i32) -> (i32, i32) {
    %c0_i32 = arith.constant 0 : i32
    %c0_i32_0 = arith.constant 0 : i32
    %c0_i32_1 = arith.constant 0 : i32
    return %c0_i32, %c0_i32_0 : i32, i32
  }
  func.func @transform_2(%arg0: i32, %arg1: i32) -> (i32, i32) {
    %c0_i32 = arith.constant 0 : i32
    %c0_i32_0 = arith.constant 0 : i32
    %c0_i32_1 = arith.constant 0 : i32
    return %c0_i32, %c0_i32_0 : i32, i32
  }
  func.func @transform_3(%arg0: i32, %arg1: i32) -> (i32, i32) {
    %c0_i32 = arith.constant 0 : i32
    return %arg1, %arg0 : i32, i32
  }
}

</mosaic_0001>

<bundles_post_ra>
// kernel: tpu_custom_call.1
= control target key start
LH: loop header
LB: loop body
LE: loop exit
PB: predicated region body
PF: predicated region fallthrough
CT: control target
= control target key end

     0   :  { %8 = vsyncpa [#allocation3], 0  ;;  %s5837_s0 = inlined_call_operand.hbm [shape: f32[2,8,1024], index: 0, kind: input, shape index: {}]   ;;  %s5838_s1 = inlined_call_operand.hbm [shape: bf16[1024,768], index: 1, kind: input, shape index: {}]   ;;  %s5839_s2 = inlined_call_operand.hbm [shape: f32[1,768], index: 2, kind: input, shape index: {}]   ;;  %s5840_s3 = inlined_call_operand.hbm [shape: bf16[8,6144], index: 3, kind: output, shape index: {}]  }
   0x1   :  { %10 = vsyncpa [#allocation3 + $0x1], 0 }
   0x2   :  { %11 = vsyncpa [#allocation6], 0 }
   0x3   :  { %12 = vsyncpa [#allocation4], 0 }
   0x4   :  { %14 = vsyncpa [#allocation4 + $0x1], 0  ;;  %s5552_s12 = smov 0   ;;  %s5554_s13 = smov 0  }
   0x5   :  { %s5556_s14 = smov 0   ;;  %s5558_s15 = smov 0  }
   0x6   :  { %s5560_s16 = smov 0   ;;  %s5562_s17 = smov 0  }
   0x7 LB: > { %s3325_s18 = sadd.s32 4294967295, %s5526_s17   ;;  %p3327_p0 = scmp.ge.s32.totalorder %s5526_s17, 1  ;;  %s5526_s17 = sphi %s5562_s17, %s20_s17   ;;  %s5522_s16 = sphi %s5560_s16, %s5850_s16   ;;  %s5518_s15 = sphi %s5558_s15, %s5849_s15   ;;  %s5514_s14 = sphi %s5556_s14, %s5848_s14   ;;  %s5510_s13 = sphi %s5554_s13, %s5847_s13   ;;  %s5506_s12 = sphi %s5552_s12, %s5846_s12  }
   0x8   : > { %p5586_p1 = scmp.eq.s32.totalorder %s3325_s18, 0  ;;  %p135_p2 = scmp.lt.s32.totalorder %s5526_s17, 3 }
   0x9   : > { %s146_s22 = sshll.u32 %s5838_s1, 4  ;;  %s5528_s24 = smov [#allocation5]   ;;  %s147_s22 = int_to_ptr.hbm [resolvable:$true] %s146_s22 }
   0xa   : > { %p5594_p3 = pnand %p3327_p0, %p135_p2  ;;  %s148_s25 = sshll.u32 %s5528_s24, 4  ;;  %s149_s25 = int_to_ptr.vmem [resolvable:$true] %s148_s25 }
   0xb   : > { %p3330_p6 = scmp.ge.s32.totalorder %s5526_s17, 2  ;;  %s161_s28 = sshll.u32 %s5839_s2, 4  ;;  %s162_s28 = int_to_ptr.hbm [resolvable:$true] %s161_s28 }
   0xc   : > { %p5276_p4 = pneg %p5594_p3  ;;  %s5529_s29 = smov 384  }
   0xd   : > { %s5530_s30 = smov 24   ;;  %s5531_s4 = smov [#allocation7]  }
   0xe   : > { %p5277_p5 = pnand %p5276_p4, %p5586_p1  ;;  %s163_s5 = sshll.u32 %s5531_s4, 4  ;;  %s164_s5 = int_to_ptr.vmem [resolvable:$true] %s163_s5 }
   0xf   : > { %s32_s6 = sadd.s32 1, %s5522_s16  ;;  %s3326_s7 = sadd.s32 4294967294, %s5526_s17  }
  0x10   : > { %5279 = dma.hbm_to_vmem [thread:$0]  (!%p5277_p5), %s147_s22, 49152, %s149_s25, [#allocation6], %s5529_s29, %s5529_s29, %s5530_s30  }
  0x11   : > { %5282 = dma.hbm_to_vmem [thread:$0]  (!%p5277_p5), %s162_s28, 96, %s164_s5, [#allocation6]  }
  0x12   : > { %p34_p7 = scmp.ge.s32.totalorder %s32_s6, 2  ;;  %s41_s8 = sadd.s32 1, %s5514_s14 }
  0x13   : > { %p48_p8 = scmp.ne.s32.totalorder %s5514_s14, %s5510_s13  ;;  %p49_p9 = scmp.eq.s32.totalorder %s5526_s17, 0 }
  0x14   : > { %s5852_s6 = smov (%p34_p7, %s32_s6), 0  ;;  %p54_p10 = scmp.ne.s32.totalorder %s5510_s13, %s5506_s12 }
  0x15   : > { %s36_s9 = ssub.s32 %s5522_s16, %s5852_s6  ;;  %p122_p11 = scmp.eq.s32.totalorder %s3325_s18, 1 }
  0x16   : > { %p39_p12 = scmp.eq.s32.totalorder %s36_s9, 0  ;;  %p5622_p13 = por %p5586_p1, %p54_p10 }
  0x17   : > { %p5626_p0 = por %p122_p11, %p48_p8  ;;  %p128_p2 = scmp.eq.s32.totalorder %s3326_s7, 1 }
  0x18   : > { %s5631_s20 = scalar_select %p39_p12, %s5514_s14, %s41_s8  }
  0x19   : > { %p50_p4 = por %p49_p9, %p48_p8  ;;  %p5633_p5 = por %p128_p2, %p54_p10 }
  0x1a   : > { %s174_s22 = sand.u32 1, %s5514_s14   ;;  %s4877_s18 = sshll.u32 %s5522_s16, 6 }
  0x1b   : > { %p5293_p7 = scmp.lt.s32.totalorder %s5526_s17, 2  ;;  %s3331_s24 = sshll.u32 %s174_s22, 6 }
  0x1c   : > { %s185_s27 = scalar_lea.hbm %s5837_s0, %s4877_s18  ;;  %s178_s29 = scalar_lea.vmem [#allocation2], %s3331_s24 }
  0x1d   : > { %s187_s28 = sshll.u32 %s185_s27, 4  ;;  %s189_s30 = sshll.u32 %s178_s29, 4  ;;  %s188_s28 = int_to_ptr.hbm [resolvable:$true] %s187_s28  ;;  %s190_s30 = int_to_ptr.vmem [resolvable:$true] %s189_s30 }
  0x1e   : > { %p5284_p11 = pnand %p5293_p7, %p50_p4  ;;  %s175_s4 = scalar_lea.sflag [#allocation3], %s174_s22 }
  0x1f   : > { %198 = sbr.rel (%p5594_p3) target bundleno = 569 (0x239), region = 32  ;;  %s5646_s5 = sand.u32 (!%p5594_p3), 1, %s5510_s13  }
  0x20   : > { %5286 = dma.hbm_to_vmem [thread:$0]  (!%p5284_p11), %s188_s28, 1024, %s190_s30, %s175_s4  }
  0x21   : > { %s3335_s7 = sshll.u32 (!%p5594_p3), %s5646_s5, 6  ;;  %s201_s8 = scalar_lea.sflag (!%p5594_p3), [#allocation3], %s5646_s5 }
  0x22   : > { %s5650_s9 = scalar_lea.vmem (!%p5594_p3), [#allocation2], %s3335_s7 }
  0x24   : > { %5493 = dma.done.wait (%p5622_p13), %s201_s8, 1024  }
  0x25   : > { %5495 = vsyncadd (%p5622_p13), %s201_s8, 4294966272 }
  0x26   : > { %5497 = dma.done.wait (%p5586_p1), [#allocation6], 49248  }
  0x27   : > { %5499 = vsyncadd (%p5586_p1), [#allocation6], 4294918048  ;;  %v3508_v0 = vld [vmem:[#allocation5 + $0x150] sm:$0xf]  ;;  %v4923_v1 = vld [vmem:[#allocation5 + $0x164] sm:$0xf0] }
  0x28   : > { %v3700_v2 = vld [vmem:[#allocation5 + $0x2d0] sm:$0xf]  ;;  %v3509_v3 = vor.u32 %v4923_v1, %v3508_v0  ;;  %v4971_v4 = vld [vmem:[#allocation5 + $0x2e4] sm:$0xf0]  ;;  %v3484_v11 = vld [vmem:[#allocation5 + $0x120] sm:$0xf] }
  0x29   : > { %v3892_v5 = vld [vmem:[#allocation5 + $0x450] sm:$0xf]  ;;  %v5019_v6 = vld [vmem:[#allocation5 + $0x464] sm:$0xf0]  ;;  %v3701_v7 = vor.u32 %v4971_v4, %v3700_v2  ;;  %v4917_v13 = vld [vmem:[#allocation5 + $0x134] sm:$0xf0] }
  0x2a   : > { %v3893_v8 = vor.u32 %v5019_v6, %v3892_v5  ;;  %v4084_v9 = vld [vmem:[#allocation5 + $0x5d0] sm:$0xf]  ;;  %v5067_v10 = vld [vmem:[#allocation5 + $0x5e4] sm:$0xf0]  ;;  %2573 = vmatpush.bf16.msra.mxu0 %v3509_v3  ;;  %v3676_v14 = vld [vmem:[#allocation5 + $0x2a0] sm:$0xf]  ;;  %v3485_v16 = vor.u32 %v4917_v13, %v3484_v11 }
  0x2b   : > { %v4085_v12 = vor.u32 %v5067_v10, %v4084_v9  ;;  %v4965_v15 = vld [vmem:[#allocation5 + $0x2b4] sm:$0xf0]  ;;  %2586 = vmatpush.bf16.msra.mxu1 %v3701_v7  ;;  %v3868_v18 = vld [vmem:[#allocation5 + $0x420] sm:$0xf]  ;;  %v3460_v23 = vld [vmem:[#allocation5 + $0xf0] sm:$0xf] }
  0x2c   : > { %2599 = vmatpush.bf16.msra.mxu2 %v3893_v8  ;;  %v3677_v17 = vor.u32 %v4965_v15, %v3676_v14  ;;  %v5013_v19 = vld [vmem:[#allocation5 + $0x434] sm:$0xf0]  ;;  %v4060_v20 = vld [vmem:[#allocation5 + $0x5a0] sm:$0xf]  ;;  %v4911_v24 = vld [vmem:[#allocation5 + $0x104] sm:$0xf0] }
  0x2d   : > { %2612 = vmatpush.bf16.msra.mxu3 %v4085_v12  ;;  %v3869_v21 = vor.u32 %v5013_v19, %v3868_v18  ;;  %v5061_v22 = vld [vmem:[#allocation5 + $0x5b4] sm:$0xf0]  ;;  %v3652_v26 = vld [vmem:[#allocation5 + $0x270] sm:$0xf]  ;;  %v4959_v27 = vld [vmem:[#allocation5 + $0x284] sm:$0xf0]  ;;  %v3461_v29 = vor.u32 %v4911_v24, %v3460_v23 }
  0x2e   : > { %v4061_v25 = vor.u32 %v5061_v22, %v4060_v20  ;;  %v3844_v28 = vld [vmem:[#allocation5 + $0x3f0] sm:$0xf]  ;;  %2574 = vmatpush.bf16.msra.mxu0 %v3485_v16  ;;  %v5007_v30 = vld [vmem:[#allocation5 + $0x404] sm:$0xf0]  ;;  %v3653_v33 = vor.u32 %v4959_v27, %v3652_v26  ;;  %v3436_v35 = vld [vmem:[#allocation5 + $0xc0] sm:$0xf] }
  0x2f   : > { %v4036_v31 = vld [vmem:[#allocation5 + $0x570] sm:$0xf]  ;;  %v5055_v32 = vld [vmem:[#allocation5 + $0x584] sm:$0xf0]  ;;  %2587 = vmatpush.bf16.msra.mxu1 %v3677_v17  ;;  %v3845_v34 = vor.u32 %v5007_v30, %v3844_v28  ;;  %v4905_v36 = vld [vmem:[#allocation5 + $0xd4] sm:$0xf0] }
  0x30   : > { %2600 = vmatpush.bf16.msra.mxu2 %v3869_v21  ;;  %v3628_v37 = vld [vmem:[#allocation5 + $0x240] sm:$0xf]  ;;  %v4037_v38 = vor.u32 %v5055_v32, %v4036_v31  ;;  %v4953_v39 = vld [vmem:[#allocation5 + $0x254] sm:$0xf0]  ;;  %v3437_v44 = vor.u32 %v4905_v36, %v3436_v35  ;;  %v3412_v47 = vld [vmem:[#allocation5 + $0x90] sm:$0xf] }
  0x31   : > { %2613 = vmatpush.bf16.msra.mxu3 %v4061_v25  ;;  %v3820_v40 = vld [vmem:[#allocation5 + $0x3c0] sm:$0xf]  ;;  %v5001_v41 = vld [vmem:[#allocation5 + $0x3d4] sm:$0xf0]  ;;  %v3629_v45 = vor.u32 %v4953_v39, %v3628_v37  ;;  %v4899_v48 = vld [vmem:[#allocation5 + $0xa4] sm:$0xf0] }
  0x32   : > { %v4012_v42 = vld [vmem:[#allocation5 + $0x540] sm:$0xf]  ;;  %v5049_v43 = vld [vmem:[#allocation5 + $0x554] sm:$0xf0]  ;;  %2575 = vmatpush.bf16.msra.mxu0 %v3461_v29  ;;  %v3821_v46 = vor.u32 %v5001_v41, %v3820_v40  ;;  %v3604_v49 = vld [vmem:[#allocation5 + $0x210] sm:$0xf]  ;;  %v3413_v56 = vor.u32 %v4899_v48, %v3412_v47 }
  0x33   : > { %2588 = vmatpush.bf16.msra.mxu1 %v3653_v33  ;;  %v4013_v50 = vor.u32 %v5049_v43, %v4012_v42  ;;  %v4947_v51 = vld [vmem:[#allocation5 + $0x224] sm:$0xf0]  ;;  %v3796_v52 = vld [vmem:[#allocation5 + $0x390] sm:$0xf]  ;;  %v3388_v59 = vld [vmem:[#allocation5 + $0x60] sm:$0xf] }
  0x34   : > { %2601 = vmatpush.bf16.msra.mxu2 %v3845_v34  ;;  %v4995_v53 = vld [vmem:[#allocation5 + $0x3a4] sm:$0xf0]  ;;  %v3988_v54 = vld [vmem:[#allocation5 + $0x510] sm:$0xf]  ;;  %v3605_v57 = vor.u32 %v4947_v51, %v3604_v49  ;;  %v4893_v60 = vld [vmem:[#allocation5 + $0x74] sm:$0xf0] }
  0x35   : > { %2614 = vmatpush.bf16.msra.mxu3 %v4037_v38  ;;  %v5043_v55 = vld [vmem:[#allocation5 + $0x524] sm:$0xf0]  ;;  %v3797_v58 = vor.u32 %v4995_v53, %v3796_v52  ;;  %v3580_v61 = vld [vmem:[#allocation5 + $0x1e0] sm:$0xf]  ;;  %v4941_v63 = vld [vmem:[#allocation5 + $0x1f4] sm:$0xf0]  ;;  %v3389_v4 = vor.u32 %v4893_v60, %v3388_v59 }
  0x36   : > { %2576 = vmatpush.bf16.msra.mxu0 %v3437_v44  ;;  %v3989_v62 = vor.u32 %v5043_v55, %v3988_v54  ;;  %v3772_v0 = vld [vmem:[#allocation5 + $0x360] sm:$0xf]  ;;  %v4989_v1 = vld [vmem:[#allocation5 + $0x374] sm:$0xf0]  ;;  %v3581_v5 = vor.u32 %v4941_v63, %v3580_v61  ;;  %v3364_v7 = vld [vmem:[#allocation5 + $0x30] sm:$0xf] }
  0x37   : > { %2589 = vmatpush.bf16.msra.mxu1 %v3629_v45  ;;  %v3964_v2 = vld [vmem:[#allocation5 + $0x4e0] sm:$0xf]  ;;  %v5037_v3 = vld [vmem:[#allocation5 + $0x4f4] sm:$0xf0]  ;;  %v3773_v6 = vor.u32 %v4989_v1, %v3772_v0  ;;  %v4887_v8 = vld [vmem:[#allocation5 + $0x44] sm:$0xf0] }
  0x38   : > { %2602 = vmatpush.bf16.msra.mxu2 %v3821_v46  ;;  %v3556_v9 = vld [vmem:[#allocation5 + $0x1b0] sm:$0xf]  ;;  %v3965_v10 = vor.u32 %v5037_v3, %v3964_v2  ;;  %v4935_v11 = vld [vmem:[#allocation5 + $0x1c4] sm:$0xf0]  ;;  %v3365_v16 = vor.u32 %v4887_v8, %v3364_v7  ;;  %v3340_v17 = vld [vmem:[#allocation5] sm:$0xf] }
  0x39   : > { %2615 = vmatpush.bf16.msra.mxu3 %v4013_v50  ;;  %v3748_v12 = vld [vmem:[#allocation5 + $0x330] sm:$0xf]  ;;  %v4983_v13 = vld [vmem:[#allocation5 + $0x344] sm:$0xf0]  ;;  %v4881_v18 = vld [vmem:[#allocation5 + $0x14] sm:$0xf0]  ;;  %v3557_v19 = vor.u32 %v4935_v11, %v3556_v9 }
  0x3a   : > { %2577 = vmatpush.bf16.msra.mxu0 %v3413_v56  ;;  %v3940_v14 = vld [vmem:[#allocation5 + $0x4b0] sm:$0xf]  ;;  %v5031_v15 = vld [vmem:[#allocation5 + $0x4c4] sm:$0xf0]  ;;  %v3749_v20 = vor.u32 %v4983_v13, %v3748_v12  ;;  %v3532_v21 = vld [vmem:[#allocation5 + $0x180] sm:$0xf]  ;;  %v3341_v31 = vor.u32 %v4881_v18, %v3340_v17 }
  0x3b   : > { %2590 = vmatpush.bf16.msra.mxu1 %v3605_v57  ;;  %v4929_v22 = vld [vmem:[#allocation5 + $0x194] sm:$0xf0]  ;;  %v3724_v23 = vld [vmem:[#allocation5 + $0x300] sm:$0xf]  ;;  %v3941_v24 = vor.u32 %v5031_v15, %v3940_v14  ;;  %v4276_v28 = vld [vmem:[#allocation5 + $0x750] sm:$0xf] }
  0x3c   : > { %2603 = vmatpush.bf16.msra.mxu2 %v3797_v58  ;;  %v4977_v25 = vld [vmem:[#allocation5 + $0x314] sm:$0xf0]  ;;  %v3916_v26 = vld [vmem:[#allocation5 + $0x480] sm:$0xf]  ;;  %v5115_v29 = vld [vmem:[#allocation5 + $0x764] sm:$0xf0]  ;;  %v3533_v35 = vor.u32 %v4929_v22, %v3532_v21 }
  0x3d   : > { %2616 = vmatpush.bf16.msra.mxu3 %v3989_v62  ;;  %v5025_v27 = vld [vmem:[#allocation5 + $0x494] sm:$0xf0]  ;;  %v4468_v30 = vld [vmem:[#allocation5 + $0x8d0] sm:$0xf]  ;;  %v5163_v32 = vld [vmem:[#allocation5 + $0x8e4] sm:$0xf0]  ;;  %v3725_v36 = vor.u32 %v4977_v25, %v3724_v23  ;;  %v4277_v40 = vor.u32 %v5115_v29, %v4276_v28 }
  0x3e   : > { %2578 = vmatpush.bf16.msra.mxu0 %v3389_v4  ;;  %v4660_v33 = vld [vmem:[#allocation5 + $0xa50] sm:$0xf]  ;;  %v5211_v34 = vld [vmem:[#allocation5 + $0xa64] sm:$0xf0]  ;;  %v3917_v39 = vor.u32 %v5025_v27, %v3916_v26  ;;  %v4469_v41 = vor.u32 %v5163_v32, %v4468_v30  ;;  %v4252_v43 = vld [vmem:[#allocation5 + $0x720] sm:$0xf] }
  0x3f   : > { %2591 = vmatpush.bf16.msra.mxu1 %v3581_v5  ;;  %v4852_v37 = vld [vmem:[#allocation5 + $0xbd0] sm:$0xf]  ;;  %v5259_v38 = vld [vmem:[#allocation5 + $0xbe4] sm:$0xf0]  ;;  %v4661_v42 = vor.u32 %v5211_v34, %v4660_v33  ;;  %v5109_v44 = vld [vmem:[#allocation5 + $0x734] sm:$0xf0] }
  0x40   : > { %2604 = vmatpush.bf16.msra.mxu2 %v3773_v6  ;;  %v4444_v45 = vld [vmem:[#allocation5 + $0x8a0] sm:$0xf]  ;;  %v4853_v46 = vor.u32 %v5259_v38, %v4852_v37  ;;  %v5157_v47 = vld [vmem:[#allocation5 + $0x8b4] sm:$0xf0]  ;;  %v4253_v52 = vor.u32 %v5109_v44, %v4252_v43  ;;  %v4228_v53 = vld [vmem:[#allocation5 + $0x6f0] sm:$0xf] }
  0x41   : > { %2617 = vmatpush.bf16.msra.mxu3 %v3965_v10  ;;  %v4636_v48 = vld [vmem:[#allocation5 + $0xa20] sm:$0xf]  ;;  %v5205_v49 = vld [vmem:[#allocation5 + $0xa34] sm:$0xf0]  ;;  %v4445_v54 = vor.u32 %v5157_v47, %v4444_v45  ;;  %v5103_v56 = vld [vmem:[#allocation5 + $0x704] sm:$0xf0] }
  0x42   : > { %2579 = vmatpush.bf16.msra.mxu0 %v3365_v16  ;;  %v4828_v50 = vld [vmem:[#allocation5 + $0xba0] sm:$0xf]  ;;  %v5253_v51 = vld [vmem:[#allocation5 + $0xbb4] sm:$0xf0]  ;;  %v4637_v55 = vor.u32 %v5205_v49, %v4636_v48  ;;  %v4420_v57 = vld [vmem:[#allocation5 + $0x870] sm:$0xf]  ;;  %v4229_v2 = vor.u32 %v5103_v56, %v4228_v53 }
  0x43   : > { %2592 = vmatpush.bf16.msra.mxu1 %v3557_v19  ;;  %v241_v58 = vld [vmem:[%s5650_s9 + $0x10] sm:$0xff]  ;;  %v4829_v59 = vor.u32 %v5253_v51, %v4828_v50  ;;  %v5151_v60 = vld [vmem:[#allocation5 + $0x884] sm:$0xf0]  ;;  %v4204_v3 = vld [vmem:[#allocation5 + $0x6c0] sm:$0xf]  ;;  %s5263_s19 = smul.u32 24, %s5646_s5 }
  0x44   : > { %2605 = vmatpush.bf16.msra.mxu2 %v3749_v20  ;;  %v4612_v61 = vld [vmem:[#allocation5 + $0x9f0] sm:$0xf]  ;;  %v5199_v62 = vld [vmem:[#allocation5 + $0xa04] sm:$0xf0]  ;;  %v5661_v63 = vpack.c.bf16 %v241_v58, %v241_v58  ;;  %v5097_v4 = vld [vmem:[#allocation5 + $0x6d4] sm:$0xf0]  ;;  %v4421_v6 = vor.u32 %v5151_v60, %v4420_v57 }
  0x45   : > { %2618 = vmatpush.bf16.msra.mxu3 %v3941_v24  ;;  %v4804_v0 = vld [vmem:[#allocation5 + $0xb70] sm:$0xf]  ;;  %v5247_v1 = vld [vmem:[#allocation5 + $0xb84] sm:$0xf0]  ;;  %v239_v5 = vld [vmem:[%s5650_s9] sm:$0xff]  ;;  %v4613_v7 = vor.u32 %v5199_v62, %v4612_v61  ;;  %v4205_v20 = vor.u32 %v5097_v4, %v4204_v3  ;;  %s5750_s23 = scalar_lea.vmem [#allocation8], %s5263_s19 }
  0x46   : > { %2580 = vmatpush.bf16.msra.mxu0 %v3341_v31  ;;  %v4396_v8 = vld [vmem:[#allocation5 + $0x840] sm:$0xf]  ;;  %v5665_v9 = vpack.c.bf16 %v239_v5, %v239_v5  ;;  %v242_v10 = vld [vmem:[%s5650_s9 + $0x18] sm:$0xff]  ;;  %v240_v11 = vld [vmem:[%s5650_s9 + $0x8] sm:$0xff]  ;;  %v4805_v12 = vor.u32 %v5247_v1, %v4804_v0  ;;  %s5262_s10 = smul.u32 24, %s5518_s15  ;;  %s3219_s25 = sshll.u32 %s5750_s23, 4  ;;  %s3220_s25 = int_to_ptr.vmem [resolvable:$true] %s3219_s25 }
  0x47   : > { %2593 = vmatpush.bf16.msra.mxu1 %v3533_v35  ;;  %v5145_v13 = vld [vmem:[#allocation5 + $0x854] sm:$0xf0]  ;;  %v4588_v14 = vld [vmem:[#allocation5 + $0x9c0] sm:$0xf]  ;;  %v5669_v16 = vpack.c.bf16 %v242_v10, %v242_v10  ;;  %v5671_v17 = vpack.c.bf16 %v240_v11, %v240_v11  ;;  %v4180_v23 = vld [vmem:[#allocation5 + $0x690] sm:$0xf] }
  0x48   : > { %2606 = vmatpush.bf16.msra.mxu2 %v3725_v36  ;;  %v5193_v15 = vld [vmem:[#allocation5 + $0x9d4] sm:$0xf0]  ;;  %v4780_v18 = vld [vmem:[#allocation5 + $0xb40] sm:$0xf]  ;;  %v4397_v21 = vor.u32 %v5145_v13, %v4396_v8  ;;  %v5091_v24 = vld [vmem:[#allocation5 + $0x6a4] sm:$0xf0]  ;;  %s3217_s24 = scalar_lea.hbm %s5840_s3, %s5262_s10 }
  0x49   : > { %2619 = vmatpush.bf16.msra.mxu3 %v3917_v39  ;;  %v5241_v19 = vld [vmem:[#allocation5 + $0xb54] sm:$0xf0]  ;;  %2581 = vmatmul.bf16.vlgmr.msra.gmra.mxu0 %v5665_v9  ;;  %v4589_v22 = vor.u32 %v5193_v15, %v4588_v14  ;;  %v4372_v25 = vld [vmem:[#allocation5 + $0x810] sm:$0xf]  ;;  %v5139_v27 = vld [vmem:[#allocation5 + $0x824] sm:$0xf0]  ;;  %v4181_v32 = vor.u32 %v5091_v24, %v4180_v23 }
  0x4a   : > { %2625 = vmatpush.bf16.msrb.mxu0 %v4277_v40  ;;  %v4781_v26 = vor.u32 %v5241_v19, %v4780_v18  ;;  %v4564_v28 = vld [vmem:[#allocation5 + $0x990] sm:$0xf]  ;;  %v5187_v29 = vld [vmem:[#allocation5 + $0x9a4] sm:$0xf0]  ;;  %2594 = vmatmul.bf16.vlgmr.msra.gmra.mxu1 %v5671_v17  ;;  %v4373_v33 = vor.u32 %v5139_v27, %v4372_v25  ;;  %v4156_v35 = vld [vmem:[#allocation5 + $0x660] sm:$0xf] }
  0x4b   : > { %2638 = vmatpush.bf16.msrb.mxu1 %v4469_v41  ;;  %2607 = vmatmul.bf16.vlgmr.msra.gmra.mxu2 %v5661_v63  ;;  %v4756_v30 = vld [vmem:[#allocation5 + $0xb10] sm:$0xf]  ;;  %v5235_v31 = vld [vmem:[#allocation5 + $0xb24] sm:$0xf0]  ;;  %v4565_v34 = vor.u32 %v5187_v29, %v4564_v28  ;;  %v5085_v36 = vld [vmem:[#allocation5 + $0x674] sm:$0xf0] }
  0x4c   : > { %2651 = vmatpush.bf16.msrb.mxu2 %v4661_v42  ;;  %2620 = vmatmul.bf16.vlgmr.msra.gmra.mxu3 %v5669_v16  ;;  %v4348_v37 = vld [vmem:[#allocation5 + $0x7e0] sm:$0xf]  ;;  %v4757_v38 = vor.u32 %v5235_v31, %v4756_v30  ;;  %v5133_v39 = vld [vmem:[#allocation5 + $0x7f4] sm:$0xf0]  ;;  %v4157_v44 = vor.u32 %v5085_v36, %v4156_v35  ;;  %v4132_v47 = vld [vmem:[#allocation5 + $0x630] sm:$0xf] }
  0x4d   : > { %2664 = vmatpush.bf16.msrb.mxu3 %v4853_v46  ;;  %v4540_v40 = vld [vmem:[#allocation5 + $0x960] sm:$0xf]  ;;  %v5181_v41 = vld [vmem:[#allocation5 + $0x974] sm:$0xf0]  ;;  %v4349_v45 = vor.u32 %v5133_v39, %v4348_v37  ;;  %v5079_v48 = vld [vmem:[#allocation5 + $0x644] sm:$0xf0] }
  0x4e   : > { %2626 = vmatpush.bf16.msrb.mxu0 %v4253_v52  ;;  %v4732_v42 = vld [vmem:[#allocation5 + $0xae0] sm:$0xf]  ;;  %v5229_v43 = vld [vmem:[#allocation5 + $0xaf4] sm:$0xf0]  ;;  %v4541_v46 = vor.u32 %v5181_v41, %v4540_v40  ;;  %v4324_v49 = vld [vmem:[#allocation5 + $0x7b0] sm:$0xf]  ;;  %v4133_v56 = vor.u32 %v5079_v48, %v4132_v47 }
  0x4f   : > { %2639 = vmatpush.bf16.msrb.mxu1 %v4445_v54  ;;  %v4733_v50 = vor.u32 %v5229_v43, %v4732_v42  ;;  %v5127_v51 = vld [vmem:[#allocation5 + $0x7c4] sm:$0xf0]  ;;  %v4516_v52 = vld [vmem:[#allocation5 + $0x930] sm:$0xf]  ;;  %v4108_v57 = vld [vmem:[#allocation5 + $0x600] sm:$0xf] }
  0x50   : > { %2652 = vmatpush.bf16.msrb.mxu2 %v4637_v55  ;;  %v5175_v53 = vld [vmem:[#allocation5 + $0x944] sm:$0xf0]  ;;  %v4708_v54 = vld [vmem:[#allocation5 + $0xab0] sm:$0xf]  ;;  %v5073_v58 = vld [vmem:[#allocation5 + $0x614] sm:$0xf0] }
  0x51   : > { %2665 = vmatpush.bf16.msrb.mxu3 %v4829_v59  ;;  %v5223_v55 = vld [vmem:[#allocation5 + $0xac4] sm:$0xf0]  ;;  %v4325_v59 = vor.u32 %v5127_v51, %v4324_v49  ;;  %v4517_v60 = vor.u32 %v5175_v53, %v4516_v52  ;;  %v4300_v61 = vld [vmem:[#allocation5 + $0x780] sm:$0xf]  ;;  %v5121_v62 = vld [vmem:[#allocation5 + $0x794] sm:$0xf0]  ;;  %v4109_v8 = vor.u32 %v5073_v58, %v4108_v57 }
  0x52   : > { %2627 = vmatpush.bf16.msrb.mxu0 %v4229_v2  ;;  %v4492_v0 = vld [vmem:[#allocation5 + $0x900] sm:$0xf]  ;;  %v4709_v1 = vor.u32 %v5223_v55, %v4708_v54  ;;  %v5169_v2 = vld [vmem:[#allocation5 + $0x914] sm:$0xf0]  ;;  %v4920_v5 = vld [vmem:[#allocation5 + $0x154] sm:$0xf]  ;;  %v4301_v13 = vor.u32 %v5121_v62, %v4300_v61 }
  0x53   : > { %2640 = vmatpush.bf16.msrb.mxu1 %v4421_v6  ;;  %v4684_v3 = vld [vmem:[#allocation5 + $0xa80] sm:$0xf]  ;;  %v5217_v4 = vld [vmem:[#allocation5 + $0xa94] sm:$0xf0]  ;;  %v3510_v6 = vld [vmem:[#allocation5 + $0x168] sm:$0xf0]  ;;  %v4493_v14 = vor.u32 %v5169_v2, %v4492_v0 }
  0x54   : > { %2653 = vmatpush.bf16.msrb.mxu2 %v4613_v7  ;;  %v4968_v7 = vld [vmem:[#allocation5 + $0x2d4] sm:$0xf]  ;;  %v3702_v10 = vld [vmem:[#allocation5 + $0x2e8] sm:$0xf0]  ;;  %v243_v23 = vld [vmem:[%s5650_s9 + $0x20] sm:$0xff]  ;;  %s3221_s26 = sshll.u32 %s3217_s24, 4  ;;  %s3222_s26 = int_to_ptr.hbm [resolvable:$true] %s3221_s26 }
  0x55   : > { %2666 = vmatpush.bf16.msrb.mxu3 %v4805_v12  ;;  %v5016_v11 = vld [vmem:[#allocation5 + $0x454] sm:$0xf]  ;;  %v3894_v12 = vld [vmem:[#allocation5 + $0x468] sm:$0xf0]  ;;  %v246_v24 = vld [vmem:[%s5650_s9 + $0x38] sm:$0xff]  ;;  %v3705_v25 = vor.u32 %v4968_v7, %v3702_v10  ;;  %v5682_v37 = vpack.c.bf16 %v243_v23, %v243_v23  ;;  %s3204_s15 = scalar_lea.sflag [#allocation4], %s5646_s5 }
  0x56   : > { %2628 = vmatpush.bf16.msrb.mxu0 %v4205_v20  ;;  %v5064_v15 = vld [vmem:[#allocation5 + $0x5d4] sm:$0xf]  ;;  %v4086_v18 = vld [vmem:[#allocation5 + $0x5e8] sm:$0xf0]  ;;  %v4685_v20 = vor.u32 %v5217_v4, %v4684_v3  ;;  %v3486_v27 = vld [vmem:[#allocation5 + $0x138] sm:$0xf0] }
  0x57   : > { %2641 = vmatpush.bf16.msrb.mxu1 %v4397_v21  ;;  %v245_v19 = vld [vmem:[%s5650_s9 + $0x30] sm:$0xff]  ;;  %v3513_v21 = vor.u32 %v4920_v5, %v3510_v6  ;;  %v4962_v28 = vld [vmem:[#allocation5 + $0x2a4] sm:$0xf]  ;;  %v244_v29 = vld [vmem:[%s5650_s9 + $0x28] sm:$0xff]  ;;  %v4089_v30 = vor.u32 %v5064_v15, %v4086_v18  ;;  %s5454_s27 = sshra.s32 %s3222_s26, 4  ;;  %s5460_s4 = scalar_lea.hbm %s5840_s3, 192  ;;  %s5455_s27 = int_to_ptr.hbm [resolvable:$true] %s5454_s27 }
  0x58   : > { %2654 = vmatpush.bf16.msrb.mxu2 %v4589_v22  ;;  %v4914_v22 = vld [vmem:[#allocation5 + $0x124] sm:$0xf]  ;;  %v3678_v31 = vld [vmem:[#allocation5 + $0x2b8] sm:$0xf0]  ;;  %v5686_v40 = vpack.c.bf16 %v244_v29, %v244_v29  ;;  %v4908_v43 = vld [vmem:[#allocation5 + $0xf4] sm:$0xf]  ;;  %p5461_p9 = scmp.lt.s32.totalorder %s5455_s27, %s5840_s3 }
  0x59   : > { %2667 = vmatpush.bf16.msrb.mxu3 %v4781_v26  ;;  %v3897_v26 = vor.u32 %v5016_v11, %v3894_v12  ;;  %v5058_v35 = vld [vmem:[#allocation5 + $0x5a4] sm:$0xf]  ;;  %v4062_v36 = vld [vmem:[#allocation5 + $0x5b8] sm:$0xf0]  ;;  %v3489_v39 = vor.u32 %v4914_v22, %v3486_v27  ;;  %v3681_v41 = vor.u32 %v4962_v28, %v3678_v31  ;;  %v3654_v47 = vld [vmem:[#allocation5 + $0x288] sm:$0xf0] }
  0x5a   : > { %2629 = vmatpush.bf16.msrb.mxu0 %v4181_v32  ;;  %v5010_v32 = vld [vmem:[#allocation5 + $0x424] sm:$0xf]  ;;  %v5004_v48 = vld [vmem:[#allocation5 + $0x3f4] sm:$0xf]  ;;  %v3846_v49 = vld [vmem:[#allocation5 + $0x408] sm:$0xf0] }
  0x5b   : > { %2642 = vmatpush.bf16.msrb.mxu1 %v4373_v33  ;;  %v3870_v33 = vld [vmem:[#allocation5 + $0x438] sm:$0xf0]  ;;  %v4038_v51 = vld [vmem:[#allocation5 + $0x588] sm:$0xf0]  ;;  %v3849_v54 = vor.u32 %v5004_v48, %v3846_v49  ;;  %v4902_v55 = vld [vmem:[#allocation5 + $0xc4] sm:$0xf] }
  0x5c   : > { %2655 = vmatpush.bf16.msrb.mxu2 %v4565_v34  ;;  %v5680_v34 = vpack.c.bf16 %v245_v19, %v245_v19  ;;  %v3873_v42 = vor.u32 %v5010_v32, %v3870_v33  ;;  %v4950_v57 = vld [vmem:[#allocation5 + $0x244] sm:$0xf]  ;;  %v3822_v61 = vld [vmem:[#allocation5 + $0x3d8] sm:$0xf0]  ;;  %v4896_v4 = vld [vmem:[#allocation5 + $0x94] sm:$0xf] }
  0x5d   : > { %2668 = vmatpush.bf16.msrb.mxu3 %v4757_v38  ;;  %v5684_v38 = vpack.c.bf16 %v246_v24, %v246_v24  ;;  %v5046_v62 = vld [vmem:[#allocation5 + $0x544] sm:$0xf]  ;;  %v4014_v0 = vld [vmem:[#allocation5 + $0x558] sm:$0xf0]  ;;  %v3414_v5 = vld [vmem:[#allocation5 + $0xa8] sm:$0xf0] }
  0x5e   : > { %2630 = vmatpush.bf16.msrb.mxu0 %v4157_v44  ;;  %v3462_v44 = vld [vmem:[#allocation5 + $0x108] sm:$0xf0]  ;;  %v4944_v6 = vld [vmem:[#allocation5 + $0x214] sm:$0xf]  ;;  %v4017_v7 = vor.u32 %v5046_v62, %v4014_v0  ;;  %v4890_v19 = vld [vmem:[#allocation5 + $0x64] sm:$0xf] }
  0x5f   : > { %2643 = vmatpush.bf16.msrb.mxu1 %v4349_v45  ;;  %v4956_v45 = vld [vmem:[#allocation5 + $0x274] sm:$0xf]  ;;  %v3465_v52 = vor.u32 %v4908_v43, %v3462_v44  ;;  %v3798_v11 = vld [vmem:[#allocation5 + $0x3a8] sm:$0xf0]  ;;  %v3582_v23 = vld [vmem:[#allocation5 + $0x1f8] sm:$0xf0] }
  0x60   : > { %2656 = vmatpush.bf16.msrb.mxu2 %v4541_v46  ;;  %v4065_v46 = vor.u32 %v5058_v35, %v4062_v36  ;;  %v3657_v53 = vor.u32 %v4956_v45, %v3654_v47  ;;  %v4992_v10 = vld [vmem:[#allocation5 + $0x394] sm:$0xf]  ;;  %v4986_v24 = vld [vmem:[#allocation5 + $0x364] sm:$0xf]  ;;  %v3966_v27 = vld [vmem:[#allocation5 + $0x4f8] sm:$0xf0] }
  0x61   : > { %2669 = vmatpush.bf16.msrb.mxu3 %v4733_v50  ;;  %v5052_v50 = vld [vmem:[#allocation5 + $0x574] sm:$0xf]  ;;  %v3801_v18 = vor.u32 %v4992_v10, %v3798_v11  ;;  %v3366_v32 = vld [vmem:[#allocation5 + $0x48] sm:$0xf0]  ;;  %v4878_v45 = vld [vmem:[#allocation5 + $0x4] sm:$0xf] }
  0x62   : > { %2631 = vmatpush.bf16.msrb.mxu0 %v4133_v56  ;;  %v3438_v56 = vld [vmem:[#allocation5 + $0xd8] sm:$0xf0]  ;;  %v4041_v58 = vor.u32 %v5052_v50, %v4038_v51  ;;  %v5040_v12 = vld [vmem:[#allocation5 + $0x514] sm:$0xf]  ;;  %v3558_v36 = vld [vmem:[#allocation5 + $0x1c8] sm:$0xf0] }
  0x63   : > { %2644 = vmatpush.bf16.msrb.mxu1 %v4325_v59  ;;  %v3630_v59 = vld [vmem:[#allocation5 + $0x258] sm:$0xf0]  ;;  %v4884_v31 = vld [vmem:[#allocation5 + $0x34] sm:$0xf]  ;;  %v3942_v43 = vld [vmem:[#allocation5 + $0x4c8] sm:$0xf0] }
  0x64   : > { %2657 = vmatpush.bf16.msrb.mxu2 %v4517_v60  ;;  %v4998_v60 = vld [vmem:[#allocation5 + $0x3c4] sm:$0xf]  ;;  %v3633_v2 = vor.u32 %v4950_v57, %v3630_v59  ;;  %v4932_v33 = vld [vmem:[#allocation5 + $0x1b4] sm:$0xf]  ;;  %v3369_v44 = vor.u32 %v4884_v31, %v3366_v32  ;;  %v3534_v50 = vld [vmem:[#allocation5 + $0x198] sm:$0xf0] }
  0x65   : > { %2670 = vmatpush.bf16.msrb.mxu3 %v4709_v1  ;;  %v3441_v1 = vor.u32 %v4902_v55, %v3438_v56  ;;  %v3825_v3 = vor.u32 %v4998_v60, %v3822_v61  ;;  %v3561_v47 = vor.u32 %v4932_v33, %v3558_v36  ;;  %v4926_v49 = vld [vmem:[#allocation5 + $0x184] sm:$0xf]  ;;  %v3918_v55 = vld [vmem:[#allocation5 + $0x498] sm:$0xf0]  ;;  %v5112_v56 = vld [vmem:[#allocation5 + $0x754] sm:$0xf] }
  0x66   : > { %2632 = vmatpush.bf16.msrb.mxu0 %v4109_v8  ;;  %v3606_v8 = vld [vmem:[#allocation5 + $0x228] sm:$0xf0]  ;;  %v4974_v51 = vld [vmem:[#allocation5 + $0x304] sm:$0xf]  ;;  %v5208_v61 = vld [vmem:[#allocation5 + $0xa54] sm:$0xf]  ;;  %v3537_v0 = vor.u32 %v4926_v49, %v3534_v50 }
  0x67   : > { %2645 = vmatpush.bf16.msrb.mxu1 %v4301_v13  ;;  %v3990_v13 = vld [vmem:[#allocation5 + $0x528] sm:$0xf0]  ;;  %v3609_v15 = vor.u32 %v4944_v6, %v3606_v8  ;;  %v5106_v8 = vld [vmem:[#allocation5 + $0x724] sm:$0xf]  ;;  %v4254_v10 = vld [vmem:[#allocation5 + $0x738] sm:$0xf0] }
  0x68   : > { %2658 = vmatpush.bf16.msrb.mxu2 %v4493_v14  ;;  %v3417_v14 = vor.u32 %v4896_v4, %v3414_v5  ;;  %v3993_v22 = vor.u32 %v5040_v12, %v3990_v13  ;;  %v4278_v57 = vld [vmem:[#allocation5 + $0x768] sm:$0xf0]  ;;  %v5154_v11 = vld [vmem:[#allocation5 + $0x8a4] sm:$0xf]  ;;  %v4446_v13 = vld [vmem:[#allocation5 + $0x8b8] sm:$0xf0] }
  0x69   : > { %2671 = vmatpush.bf16.msrb.mxu3 %v4685_v20  ;;  %2633 = vmatmul.bf16.vlgmr.msrb.gmra.mxu0 %v5682_v37  ;;  %v3390_v20 = vld [vmem:[#allocation5 + $0x78] sm:$0xf0]  ;;  %v4470_v60 = vld [vmem:[#allocation5 + $0x8e8] sm:$0xf0]  ;;  %v4281_v5 = vor.u32 %v5112_v56, %v4278_v57  ;;  %v5094_v36 = vld [vmem:[#allocation5 + $0x6c4] sm:$0xf] }
  0x6a   : > { %2677 = vmatpush.bf16.msra.mxu0 %v3513_v21  ;;  %2646 = vmatmul.bf16.vlgmr.msrb.gmra.mxu1 %v5686_v40  ;;  %v4938_v21 = vld [vmem:[#allocation5 + $0x1e4] sm:$0xf]  ;;  %v3393_v28 = vor.u32 %v4890_v19, %v3390_v20  ;;  %v4662_v62 = vld [vmem:[#allocation5 + $0xa68] sm:$0xf0]  ;;  %v4830_v19 = vld [vmem:[#allocation5 + $0xbb8] sm:$0xf0]  ;;  %v4257_v20 = vor.u32 %v5106_v8, %v4254_v10 }
  0x6b   : > { %2690 = vmatpush.bf16.msra.mxu1 %v3705_v25  ;;  %2659 = vmatmul.bf16.vlgmr.msrb.gmra.mxu2 %v5680_v34  ;;  %v3774_v25 = vld [vmem:[#allocation5 + $0x378] sm:$0xf0]  ;;  %v3585_v29 = vor.u32 %v4938_v21, %v3582_v23  ;;  %v4449_v21 = vor.u32 %v5154_v11, %v4446_v13  ;;  %v5100_v23 = vld [vmem:[#allocation5 + $0x6f4] sm:$0xf]  ;;  %v4806_v31 = vld [vmem:[#allocation5 + $0xb88] sm:$0xf0] }
  0x6c   : > { %2703 = vmatpush.bf16.msra.mxu2 %v3897_v26  ;;  %2672 = vmatmul.bf16.vlgmr.msrb.gmra.mxu3 %v5684_v38  ;;  %v5034_v26 = vld [vmem:[#allocation5 + $0x4e4] sm:$0xf]  ;;  %v5184_v56 = vld [vmem:[#allocation5 + $0x994] sm:$0xf]  ;;  %v4566_v57 = vld [vmem:[#allocation5 + $0x9a8] sm:$0xf0] }
  0x6d   : > { %2716 = vmatpush.bf16.msra.mxu3 %v4089_v30  ;;  %v3777_v30 = vor.u32 %v4986_v24, %v3774_v25  ;;  %v3969_v35 = vor.u32 %v5034_v26, %v3966_v27  ;;  %v4230_v24 = vld [vmem:[#allocation5 + $0x708] sm:$0xf0]  ;;  %v5148_v25 = vld [vmem:[#allocation5 + $0x874] sm:$0xf]  ;;  %v4734_v8 = vld [vmem:[#allocation5 + $0xaf8] sm:$0xf0] }
  0x6e   : > { %2678 = vmatpush.bf16.msra.mxu0 %v3489_v39  ;;  %v4980_v39 = vld [vmem:[#allocation5 + $0x334] sm:$0xf]  ;;  %v4422_v27 = vld [vmem:[#allocation5 + $0x888] sm:$0xf0]  ;;  %v4233_v32 = vor.u32 %v5100_v23, %v4230_v24  ;;  %s5456_s28 = scalar_lea.hbm %s5455_s27, 24 }
  0x6f   : > { %2691 = vmatpush.bf16.msra.mxu1 %v3681_v41  ;;  %v3750_v41 = vld [vmem:[#allocation5 + $0x348] sm:$0xf0]  ;;  %v4425_v33 = vor.u32 %v5148_v25, %v4422_v27  ;;  %v5076_v13 = vld [vmem:[#allocation5 + $0x634] sm:$0xf]  ;;  %v5070_v25 = vld [vmem:[#allocation5 + $0x604] sm:$0xf]  ;;  %p5457_p1 = scmp.ne.s32.totalorder %s5455_s27, %s5456_s28  ;;  %p5462_p10 = scmp.lt.s32.totalorder %s5460_s4, %s5456_s28 }
  0x70   : > { %2704 = vmatpush.bf16.msra.mxu2 %v3873_v42  ;;  %v5028_v42 = vld [vmem:[#allocation5 + $0x4b4] sm:$0xf]  ;;  %v3753_v48 = vor.u32 %v4980_v39, %v3750_v41  ;;  %v4206_v39 = vld [vmem:[#allocation5 + $0x6d8] sm:$0xf0]  ;;  %v5142_v41 = vld [vmem:[#allocation5 + $0x844] sm:$0xf] }
  0x71   : > { %2717 = vmatpush.bf16.msra.mxu3 %v4065_v46  ;;  %v3342_v46 = vld [vmem:[#allocation5 + $0x18] sm:$0xf0]  ;;  %v4710_v23 = vld [vmem:[#allocation5 + $0xac8] sm:$0xf0]  ;;  %p5458_p3 = pnand %p5457_p1, %p5626_p0  ;;  %p5463_p12 = por %p5462_p10, %p5461_p9 }
  0x72   : > { %2679 = vmatpush.bf16.msra.mxu0 %v3465_v52  ;;  %v3945_v52 = vor.u32 %v5028_v42, %v3942_v43  ;;  %v3345_v59 = vor.u32 %v4878_v45, %v3342_v46  ;;  %v4398_v43 = vld [vmem:[#allocation5 + $0x858] sm:$0xf0]  ;;  %v5238_v46 = vld [vmem:[#allocation5 + $0xb44] sm:$0xf] }
  0x73   : > { %2692 = vmatpush.bf16.msra.mxu1 %v3657_v53  ;;  %v3726_v53 = vld [vmem:[#allocation5 + $0x318] sm:$0xf0]  ;;  %v4401_v49 = vor.u32 %v5142_v41, %v4398_v43  ;;  %v4924_v41 = vld [vmem:[#allocation5 + $0x16c] sm:$0xf0]  ;;  %p5459_p8 = pneg %p5458_p3 }
  0x74   : > { %2705 = vmatpush.bf16.msra.mxu2 %v3849_v54  ;;  %v5022_v54 = vld [vmem:[#allocation5 + $0x484] sm:$0xf]  ;;  %v4590_v45 = vld [vmem:[#allocation5 + $0x9d8] sm:$0xf0] }
  0x75   : > { %2718 = vmatpush.bf16.msra.mxu3 %v4041_v58  ;;  %v5160_v58 = vld [vmem:[#allocation5 + $0x8d4] sm:$0xf]  ;;  %v3921_v4 = vor.u32 %v5022_v54, %v3918_v55  ;;  %v4374_v55 = vld [vmem:[#allocation5 + $0x828] sm:$0xf0]  ;;  %p5464_p13 = pnand %p5463_p12, %p5459_p8 }
  0x76   : > { %2680 = vmatpush.bf16.msra.mxu0 %v3441_v1  ;;  %v3729_v1 = vor.u32 %v4974_v51, %v3726_v53  ;;  %v4473_v6 = vor.u32 %v5160_v58, %v4470_v60  ;;  %v5088_v51 = vld [vmem:[#allocation5 + $0x694] sm:$0xf] }
  0x77   : > { %2693 = vmatpush.bf16.msra.mxu1 %v3633_v2  ;;  %v5256_v2 = vld [vmem:[#allocation5 + $0xbd4] sm:$0xf] }
  0x78   : > { %2706 = vmatpush.bf16.msra.mxu2 %v3825_v3  ;;  %v4854_v3 = vld [vmem:[#allocation5 + $0xbe8] sm:$0xf0]  ;;  %v5136_v53 = vld [vmem:[#allocation5 + $0x814] sm:$0xf] }
  0x79   : > { %2719 = vmatpush.bf16.msra.mxu3 %v4017_v7  ;;  %v4665_v7 = vor.u32 %v5208_v61, %v4662_v62  ;;  %v4857_v12 = vor.u32 %v5256_v2, %v4854_v3  ;;  %v5232_v58 = vld [vmem:[#allocation5 + $0xb14] sm:$0xf]  ;;  %v4377_v61 = vor.u32 %v5136_v53, %v4374_v55  ;;  %v4569_v62 = vor.u32 %v5184_v56, %v4566_v57  ;;  %v5130_v2 = vld [vmem:[#allocation5 + $0x7e4] sm:$0xf]  ;;  %v3492_v55 = vld [vmem:[#allocation5 + $0x128] sm:$0xf] }
  0x7a   : > { %2681 = vmatpush.bf16.msra.mxu0 %v3417_v14  ;;  %v5202_v14 = vld [vmem:[#allocation5 + $0xa24] sm:$0xf]  ;;  %v4918_v56 = vld [vmem:[#allocation5 + $0x13c] sm:$0xf0]  ;;  %v3684_v57 = vld [vmem:[#allocation5 + $0x2a8] sm:$0xf] }
  0x7b   : > { %2694 = vmatpush.bf16.msra.mxu1 %v3609_v15  ;;  %v4638_v15 = vld [vmem:[#allocation5 + $0xa38] sm:$0xf0] }
  0x7c   : > { %2707 = vmatpush.bf16.msra.mxu2 %v3801_v18  ;;  %v5250_v18 = vld [vmem:[#allocation5 + $0xba4] sm:$0xf] }
  0x7d   : > { %2720 = vmatpush.bf16.msra.mxu3 %v3993_v22  ;;  %v4641_v22 = vor.u32 %v5202_v14, %v4638_v15  ;;  %v4833_v26 = vor.u32 %v5250_v18, %v4830_v19  ;;  %v4134_v14 = vld [vmem:[#allocation5 + $0x648] sm:$0xf0]  ;;  %v5124_v15 = vld [vmem:[#allocation5 + $0x7b4] sm:$0xf] }
  0x7e   : > { %2682 = vmatpush.bf16.msra.mxu0 %v3393_v28  ;;  %v5196_v28 = vld [vmem:[#allocation5 + $0x9f4] sm:$0xf]  ;;  %v4326_v19 = vld [vmem:[#allocation5 + $0x7c8] sm:$0xf0]  ;;  %v4137_v24 = vor.u32 %v5076_v13, %v4134_v14  ;;  %v5056_v13 = vld [vmem:[#allocation5 + $0x58c] sm:$0xf0] }
  0x7f   : > { %2695 = vmatpush.bf16.msra.mxu1 %v3585_v29  ;;  %v4614_v29 = vld [vmem:[#allocation5 + $0xa08] sm:$0xf0]  ;;  %v4329_v27 = vor.u32 %v5124_v15, %v4326_v19  ;;  %v3444_v19 = vld [vmem:[#allocation5 + $0xc8] sm:$0xf] }
  0x80   : > { %2708 = vmatpush.bf16.msra.mxu2 %v3777_v30  ;;  %v5244_v30 = vld [vmem:[#allocation5 + $0xb74] sm:$0xf] }
  0x81   : > { %2721 = vmatpush.bf16.msra.mxu3 %v3969_v35  ;;  %v4617_v35 = vor.u32 %v5196_v28, %v4614_v29  ;;  %v4809_v42 = vor.u32 %v5244_v30, %v4806_v31  ;;  %v5118_v29 = vld [vmem:[#allocation5 + $0x784] sm:$0xf]  ;;  %v4302_v30 = vld [vmem:[#allocation5 + $0x798] sm:$0xf0] }
  0x82   : > { %2683 = vmatpush.bf16.msra.mxu0 %v3369_v44  ;;  %v5190_v44 = vld [vmem:[#allocation5 + $0x9c4] sm:$0xf] }
  0x83   : > { %2696 = vmatpush.bf16.msra.mxu1 %v3561_v47  ;;  %v4782_v47 = vld [vmem:[#allocation5 + $0xb58] sm:$0xf0]  ;;  %v4593_v50 = vor.u32 %v5190_v44, %v4590_v45  ;;  %v5166_v31 = vld [vmem:[#allocation5 + $0x904] sm:$0xf]  ;;  %v4972_v44 = vld [vmem:[#allocation5 + $0x2ec] sm:$0xf0] }
  0x84   : > { %2709 = vmatpush.bf16.msra.mxu2 %v3753_v48  ;;  %v4209_v48 = vor.u32 %v5094_v36, %v4206_v39  ;;  %v4785_v54 = vor.u32 %v5238_v46, %v4782_v47  ;;  %v4686_v36 = vld [vmem:[#allocation5 + $0xa98] sm:$0xf0]  ;;  %v3516_v39 = vld [vmem:[#allocation5 + $0x158] sm:$0xf]  ;;  %v5020_v46 = vld [vmem:[#allocation5 + $0x46c] sm:$0xf0]  ;;  %v4305_v47 = vor.u32 %v5118_v29, %v4302_v30 }
  0x85   : > { %2722 = vmatpush.bf16.msra.mxu3 %v3945_v52  ;;  %v4182_v52 = vld [vmem:[#allocation5 + $0x6a8] sm:$0xf0]  ;;  %v3900_v45 = vld [vmem:[#allocation5 + $0x458] sm:$0xf] }
  0x86   : > { %2684 = vmatpush.bf16.msra.mxu0 %v3345_v59  ;;  %v4758_v59 = vld [vmem:[#allocation5 + $0xb28] sm:$0xf0]  ;;  %v4185_v60 = vor.u32 %v5088_v51, %v4182_v52  ;;  %v3517_v52 = vor.u32 %v4924_v41, %v3516_v39  ;;  %v3804_v39 = vld [vmem:[#allocation5 + $0x398] sm:$0xf]  ;;  %v4996_v41 = vld [vmem:[#allocation5 + $0x3ac] sm:$0xf0] }
  0x87   : > { %2697 = vmatpush.bf16.msra.mxu1 %v3537_v0  ;;  %v5082_v0 = vld [vmem:[#allocation5 + $0x664] sm:$0xf]  ;;  %v4761_v3 = vor.u32 %v5232_v58, %v4758_v59  ;;  %v4966_v59 = vld [vmem:[#allocation5 + $0x2bc] sm:$0xf0] }
  0x88   : > { %2710 = vmatpush.bf16.msra.mxu2 %v3729_v1  ;;  %v4158_v1 = vld [vmem:[#allocation5 + $0x678] sm:$0xf0] }
  0x89   : > { %2723 = vmatpush.bf16.msra.mxu3 %v3921_v4  ;;  %2685 = vmatmul.bf16.vlgmr.msra.gmra.mxu0 %v5665_v9  ;;  %v4350_v4 = vld [vmem:[#allocation5 + $0x7f8] sm:$0xf0]  ;;  %v4161_v10 = vor.u32 %v5082_v0, %v4158_v1  ;;  %v5062_v0 = vld [vmem:[#allocation5 + $0x5bc] sm:$0xf0]  ;;  %v3493_v1 = vor.u32 %v4918_v56, %v3492_v55 }
  0x8a   : > { %2729 = vmatpush.bf16.msrb.mxu0 %v4281_v5  ;;  %2698 = vmatmul.bf16.vlgmr.msra.gmra.mxu1 %v5671_v17  ;;  %v5178_v5 = vld [vmem:[#allocation5 + $0x964] sm:$0xf]  ;;  %v4353_v11 = vor.u32 %v5130_v2, %v4350_v4  ;;  %v3685_v2 = vor.u32 %v4966_v59, %v3684_v57  ;;  %v3468_v4 = vld [vmem:[#allocation5 + $0xf8] sm:$0xf]  ;;  %v5038_v55 = vld [vmem:[#allocation5 + $0x4fc] sm:$0xf0] }
  0x8b   : > { %2742 = vmatpush.bf16.msrb.mxu1 %v4473_v6  ;;  %2711 = vmatmul.bf16.vlgmr.msra.gmra.mxu2 %v5661_v63  ;;  %v4542_v6 = vld [vmem:[#allocation5 + $0x978] sm:$0xf0]  ;;  %v3372_v59 = vld [vmem:[#allocation5 + $0x38] sm:$0xf] }
  0x8c   : > { %2755 = vmatpush.bf16.msrb.mxu2 %v4665_v7  ;;  %2724 = vmatmul.bf16.vlgmr.msra.gmra.mxu3 %v5669_v16  ;;  %v5226_v7 = vld [vmem:[#allocation5 + $0xae4] sm:$0xf] }
  0x8d   : > { %2768 = vmatpush.bf16.msrb.mxu3 %v4857_v12  ;;  %v4545_v12 = vor.u32 %v5178_v5, %v4542_v6  ;;  %v4737_v18 = vor.u32 %v5226_v7, %v4734_v8  ;;  %v4912_v5 = vld [vmem:[#allocation5 + $0x10c] sm:$0xf0]  ;;  %v3660_v6 = vld [vmem:[#allocation5 + $0x278] sm:$0xf] }
  0x8e   : > { %2730 = vmatpush.bf16.msrb.mxu0 %v4257_v20  ;;  %v5172_v20 = vld [vmem:[#allocation5 + $0x934] sm:$0xf]  ;;  %v4960_v8 = vld [vmem:[#allocation5 + $0x28c] sm:$0xf0]  ;;  %v3469_v14 = vor.u32 %v4912_v5, %v3468_v4 }
  0x8f   : > { %2743 = vmatpush.bf16.msrb.mxu1 %v4449_v21  ;;  %v4518_v21 = vld [vmem:[#allocation5 + $0x948] sm:$0xf0]  ;;  %v3661_v15 = vor.u32 %v4960_v8, %v3660_v6  ;;  %v5032_v4 = vld [vmem:[#allocation5 + $0x4cc] sm:$0xf0]  ;;  %v3348_v6 = vld [vmem:[#allocation5 + $0x8] sm:$0xf] }
  0x90   : > { %2756 = vmatpush.bf16.msrb.mxu2 %v4641_v22  ;;  %v5220_v22 = vld [vmem:[#allocation5 + $0xab4] sm:$0xf]  ;;  %v4521_v28 = vor.u32 %v5172_v20, %v4518_v21  ;;  %v4906_v20 = vld [vmem:[#allocation5 + $0xdc] sm:$0xf0]  ;;  %v3636_v21 = vld [vmem:[#allocation5 + $0x248] sm:$0xf] }
  0x91   : > { %2769 = vmatpush.bf16.msrb.mxu3 %v4833_v26  ;;  %v4110_v26 = vld [vmem:[#allocation5 + $0x618] sm:$0xf0] }
  0x92   : > { %2731 = vmatpush.bf16.msrb.mxu0 %v4233_v32  ;;  %v4713_v32 = vor.u32 %v5220_v22, %v4710_v23  ;;  %v4113_v43 = vor.u32 %v5070_v25, %v4110_v26  ;;  %v4954_v23 = vld [vmem:[#allocation5 + $0x25c] sm:$0xf0]  ;;  %v4020_v26 = vld [vmem:[#allocation5 + $0x548] sm:$0xf] }
  0x93   : > { %2744 = vmatpush.bf16.msrb.mxu1 %v4425_v33  ;;  %v4494_v33 = vld [vmem:[#allocation5 + $0x918] sm:$0xf0]  ;;  %v5002_v25 = vld [vmem:[#allocation5 + $0x3dc] sm:$0xf0]  ;;  %v3637_v29 = vor.u32 %v4954_v23, %v3636_v21  ;;  %v5116_v21 = vld [vmem:[#allocation5 + $0x76c] sm:$0xf0] }
  0x94   : > { %2757 = vmatpush.bf16.msrb.mxu2 %v4617_v35  ;;  %v5214_v35 = vld [vmem:[#allocation5 + $0xa84] sm:$0xf] }
  0x95   : > { %2770 = vmatpush.bf16.msrb.mxu3 %v4809_v42  ;;  %v3708_v42 = vld [vmem:[#allocation5 + $0x2d8] sm:$0xf]  ;;  %v4689_v51 = vor.u32 %v5214_v35, %v4686_v36  ;;  %v4948_v36 = vld [vmem:[#allocation5 + $0x22c] sm:$0xf0] }
  0x96   : > { %2732 = vmatpush.bf16.msrb.mxu0 %v4209_v48  ;;  %v4497_v48 = vor.u32 %v5166_v31, %v4494_v33  ;;  %v3709_v53 = vor.u32 %v4972_v44, %v3708_v42  ;;  %v3420_v31 = vld [vmem:[#allocation5 + $0x98] sm:$0xf] }
  0x97   : > { %2745 = vmatpush.bf16.msrb.mxu1 %v4401_v49  ;;  %v4092_v49 = vld [vmem:[#allocation5 + $0x5d8] sm:$0xf] }
  0x98   : > { %2758 = vmatpush.bf16.msrb.mxu2 %v4593_v50  ;;  %v5068_v50 = vld [vmem:[#allocation5 + $0x5ec] sm:$0xf0]  ;;  %v3612_v33 = vld [vmem:[#allocation5 + $0x218] sm:$0xf] }
  0x99   : > { %2771 = vmatpush.bf16.msrb.mxu3 %v4785_v54  ;;  %v3901_v54 = vor.u32 %v5020_v46, %v3900_v45  ;;  %v4093_v58 = vor.u32 %v5068_v50, %v4092_v49  ;;  %v3996_v42 = vld [vmem:[#allocation5 + $0x518] sm:$0xf]  ;;  %v3613_v45 = vor.u32 %v4948_v36, %v3612_v33  ;;  %v3805_v46 = vor.u32 %v4996_v41, %v3804_v39  ;;  %v3588_v49 = vld [vmem:[#allocation5 + $0x1e8] sm:$0xf]  ;;  %v5110_v39 = vld [vmem:[#allocation5 + $0x73c] sm:$0xf0] }
  0x9a   : > { %2733 = vmatpush.bf16.msrb.mxu0 %v4185_v60  ;;  %v3876_v60 = vld [vmem:[#allocation5 + $0x428] sm:$0xf] }
  0x9b   : > { %2746 = vmatpush.bf16.msrb.mxu1 %v4377_v61  ;;  %v5014_v61 = vld [vmem:[#allocation5 + $0x43c] sm:$0xf0]  ;;  %v4260_v36 = vld [vmem:[#allocation5 + $0x728] sm:$0xf] }
  0x9c   : > { %2759 = vmatpush.bf16.msrb.mxu2 %v4569_v62  ;;  %v4068_v62 = vld [vmem:[#allocation5 + $0x5a8] sm:$0xf] }
  0x9d   : > { %2772 = vmatpush.bf16.msrb.mxu3 %v4761_v3  ;;  %v3877_v3 = vor.u32 %v5014_v61, %v3876_v60  ;;  %v4069_v7 = vor.u32 %v5062_v0, %v4068_v62  ;;  %v4888_v60 = vld [vmem:[#allocation5 + $0x4c] sm:$0xf0]  ;;  %v3564_v61 = vld [vmem:[#allocation5 + $0x1b8] sm:$0xf]  ;;  %v4452_v41 = vld [vmem:[#allocation5 + $0x8a8] sm:$0xf] }
  0x9e   : > { %2734 = vmatpush.bf16.msrb.mxu0 %v4161_v10  ;;  %v3852_v10 = vld [vmem:[#allocation5 + $0x3f8] sm:$0xf]  ;;  %v4936_v0 = vld [vmem:[#allocation5 + $0x1cc] sm:$0xf0]  ;;  %v3373_v5 = vor.u32 %v4888_v60, %v3372_v59 }
  0x9f   : > { %2747 = vmatpush.bf16.msrb.mxu1 %v4353_v11  ;;  %v5008_v11 = vld [vmem:[#allocation5 + $0x40c] sm:$0xf0]  ;;  %v3565_v8 = vor.u32 %v4936_v0, %v3564_v61  ;;  %v4212_v61 = vld [vmem:[#allocation5 + $0x6c8] sm:$0xf] }
  0xa0   : > { %2760 = vmatpush.bf16.msrb.mxu2 %v4545_v12  ;;  %v4044_v12 = vld [vmem:[#allocation5 + $0x578] sm:$0xf]  ;;  %v5248_v59 = vld [vmem:[#allocation5 + $0xb8c] sm:$0xf0] }
  0xa1   : > { %2773 = vmatpush.bf16.msrb.mxu3 %v4737_v18  ;;  %v3853_v18 = vor.u32 %v5008_v11, %v3852_v10  ;;  %v4045_v22 = vor.u32 %v5056_v13, %v4044_v12  ;;  %v3540_v11 = vld [vmem:[#allocation5 + $0x188] sm:$0xf]  ;;  %v4930_v12 = vld [vmem:[#allocation5 + $0x19c] sm:$0xf0] }
  0xa2   : > { %2735 = vmatpush.bf16.msrb.mxu0 %v4137_v24  ;;  %v3828_v24 = vld [vmem:[#allocation5 + $0x3c8] sm:$0xf] }
  0xa3   : > { %2748 = vmatpush.bf16.msrb.mxu1 %v4329_v27  ;;  %v5050_v27 = vld [vmem:[#allocation5 + $0x55c] sm:$0xf0]  ;;  %v3829_v30 = vor.u32 %v5002_v25, %v3828_v24  ;;  %v3732_v13 = vld [vmem:[#allocation5 + $0x308] sm:$0xf]  ;;  %v5164_v24 = vld [vmem:[#allocation5 + $0x8ec] sm:$0xf0] }
  0xa4   : > { %2761 = vmatpush.bf16.msrb.mxu2 %v4521_v28  ;;  %v3445_v28 = vor.u32 %v4906_v20, %v3444_v19  ;;  %v4021_v35 = vor.u32 %v5050_v27, %v4020_v26  ;;  %v5026_v19 = vld [vmem:[#allocation5 + $0x49c] sm:$0xf0]  ;;  %v4284_v20 = vld [vmem:[#allocation5 + $0x758] sm:$0xf]  ;;  %v5212_v26 = vld [vmem:[#allocation5 + $0xa6c] sm:$0xf0]  ;;  %v3541_v27 = vor.u32 %v4930_v12, %v3540_v11 }
  0xa5   : > { %2774 = vmatpush.bf16.msrb.mxu3 %v4713_v32  ;;  %v4900_v32 = vld [vmem:[#allocation5 + $0xac] sm:$0xf0]  ;;  %v4668_v25 = vld [vmem:[#allocation5 + $0xa58] sm:$0xf] }
  0xa6   : > { %2736 = vmatpush.bf16.msrb.mxu0 %v4113_v43  ;;  %v5044_v43 = vld [vmem:[#allocation5 + $0x52c] sm:$0xf0]  ;;  %v3421_v44 = vor.u32 %v4900_v32, %v3420_v31  ;;  %v4285_v32 = vor.u32 %v5116_v21, %v4284_v20  ;;  %v4188_v12 = vld [vmem:[#allocation5 + $0x698] sm:$0xf] }
  0xa7   : > { %2749 = vmatpush.bf16.msrb.mxu1 %v4305_v47  ;;  %v3396_v47 = vld [vmem:[#allocation5 + $0x68] sm:$0xf]  ;;  %v3997_v50 = vor.u32 %v5044_v43, %v3996_v42  ;;  %v5158_v43 = vld [vmem:[#allocation5 + $0x8bc] sm:$0xf0]  ;;  %v5140_v21 = vld [vmem:[#allocation5 + $0x82c] sm:$0xf0] }
  0xa8   : > { %2762 = vmatpush.bf16.msrb.mxu2 %v4497_v48  ;;  %v4894_v48 = vld [vmem:[#allocation5 + $0x7c] sm:$0xf0] }
  0xa9   : > { %2775 = vmatpush.bf16.msrb.mxu3 %v4689_v51  ;;  %2737 = vmatmul.bf16.vlgmr.msrb.gmra.mxu0 %v5682_v37  ;;  %v4942_v51 = vld [vmem:[#allocation5 + $0x1fc] sm:$0xf0]  ;;  %v3397_v56 = vor.u32 %v4894_v48, %v3396_v47  ;;  %v4261_v48 = vor.u32 %v5110_v39, %v4260_v36  ;;  %v4548_v39 = vld [vmem:[#allocation5 + $0x968] sm:$0xf] }
  0xaa   : > { %2781 = vmatpush.bf16.msra.mxu0 %v3517_v52  ;;  %2750 = vmatmul.bf16.vlgmr.msrb.gmra.mxu1 %v5686_v40  ;;  %v3780_v52 = vld [vmem:[#allocation5 + $0x368] sm:$0xf]  ;;  %v3589_v57 = vor.u32 %v4942_v51, %v3588_v49  ;;  %v5254_v47 = vld [vmem:[#allocation5 + $0xbbc] sm:$0xf0]  ;;  %v4453_v49 = vor.u32 %v5158_v43, %v4452_v41  ;;  %v4236_v51 = vld [vmem:[#allocation5 + $0x6f8] sm:$0xf] }
  0xab   : > { %2794 = vmatpush.bf16.msra.mxu1 %v3709_v53  ;;  %2763 = vmatmul.bf16.vlgmr.msrb.gmra.mxu2 %v5680_v34  ;;  %v4990_v53 = vld [vmem:[#allocation5 + $0x37c] sm:$0xf0] }
  0xac   : > { %2807 = vmatpush.bf16.msra.mxu2 %v3901_v54  ;;  %2776 = vmatmul.bf16.vlgmr.msrb.gmra.mxu3 %v5684_v38  ;;  %v3972_v54 = vld [vmem:[#allocation5 + $0x4e8] sm:$0xf]  ;;  %v5134_v36 = vld [vmem:[#allocation5 + $0x7fc] sm:$0xf0] }
  0xad   : > { %2820 = vmatpush.bf16.msra.mxu3 %v4093_v58  ;;  %v3781_v58 = vor.u32 %v4990_v53, %v3780_v52  ;;  %v3973_v62 = vor.u32 %v5038_v55, %v3972_v54  ;;  %v5104_v52 = vld [vmem:[#allocation5 + $0x70c] sm:$0xf0]  ;;  %v4428_v53 = vld [vmem:[#allocation5 + $0x878] sm:$0xf]  ;;  %v5182_v41 = vld [vmem:[#allocation5 + $0x97c] sm:$0xf0] }
  0xae   : > { %2782 = vmatpush.bf16.msra.mxu0 %v3493_v1  ;;  %v3756_v1 = vld [vmem:[#allocation5 + $0x338] sm:$0xf]  ;;  %v5152_v55 = vld [vmem:[#allocation5 + $0x88c] sm:$0xf0]  ;;  %v4237_v60 = vor.u32 %v5104_v52, %v4236_v51  ;;  %v5230_v43 = vld [vmem:[#allocation5 + $0xafc] sm:$0xf0] }
  0xaf   : > { %2795 = vmatpush.bf16.msra.mxu1 %v3685_v2  ;;  %v4984_v2 = vld [vmem:[#allocation5 + $0x34c] sm:$0xf0]  ;;  %v4332_v52 = vld [vmem:[#allocation5 + $0x7b8] sm:$0xf] }
  0xb0   : > { %2808 = vmatpush.bf16.msra.mxu2 %v3877_v3  ;;  %v3948_v3 = vld [vmem:[#allocation5 + $0x4b8] sm:$0xf]  ;;  %v3757_v10 = vor.u32 %v4984_v2, %v3756_v1  ;;  %v5098_v1 = vld [vmem:[#allocation5 + $0x6dc] sm:$0xf0]  ;;  %v4404_v2 = vld [vmem:[#allocation5 + $0x848] sm:$0xf] }
  0xb1   : > { %2821 = vmatpush.bf16.msra.mxu3 %v4069_v7  ;;  %v4882_v7 = vld [vmem:[#allocation5 + $0x1c] sm:$0xf0]  ;;  %v4213_v11 = vor.u32 %v5098_v1, %v4212_v61  ;;  %v5080_v51 = vld [vmem:[#allocation5 + $0x64c] sm:$0xf0] }
  0xb2   : > { %2783 = vmatpush.bf16.msra.mxu0 %v3469_v14  ;;  %v3949_v14 = vor.u32 %v5032_v4, %v3948_v3  ;;  %v3349_v23 = vor.u32 %v4882_v7, %v3348_v6  ;;  %v5146_v3 = vld [vmem:[#allocation5 + $0x85c] sm:$0xf0] }
  0xb3   : > { %2796 = vmatpush.bf16.msra.mxu1 %v3661_v15  ;;  %v4978_v15 = vld [vmem:[#allocation5 + $0x31c] sm:$0xf0] }
  0xb4   : > { %2809 = vmatpush.bf16.msra.mxu2 %v3853_v18  ;;  %v3924_v18 = vld [vmem:[#allocation5 + $0x488] sm:$0xf]  ;;  %v5194_v6 = vld [vmem:[#allocation5 + $0x9dc] sm:$0xf0] }
  0xb5   : > { %2822 = vmatpush.bf16.msra.mxu3 %v4045_v22  ;;  %v4476_v22 = vld [vmem:[#allocation5 + $0x8d8] sm:$0xf]  ;;  %v3925_v31 = vor.u32 %v5026_v19, %v3924_v18  ;;  %v5704_v7 = vld [vmem:[#allocation7] sm:$0x3f] }
  0xb6   : > { %2784 = vmatpush.bf16.msra.mxu0 %v3445_v28  ;;  %v3733_v28 = vor.u32 %v4978_v15, %v3732_v13  ;;  %v4477_v33 = vor.u32 %v5164_v24, %v4476_v22  ;;  %v4405_v13 = vor.u32 %v5146_v3, %v4404_v2  ;;  %v5092_v15 = vld [vmem:[#allocation5 + $0x6ac] sm:$0xf0]  ;;  %v4380_v18 = vld [vmem:[#allocation5 + $0x818] sm:$0xf]  ;;  %v641_v19 = vperm.slane %v5704_v7, 0 }
  0xb7   : > { %2797 = vmatpush.bf16.msra.mxu1 %v3637_v29  ;;  %v4860_v29 = vld [vmem:[#allocation5 + $0xbd8] sm:$0xf] }
  0xb8   : > { %2810 = vmatpush.bf16.msra.mxu2 %v3829_v30  ;;  %v5260_v30 = vld [vmem:[#allocation5 + $0xbec] sm:$0xf0]  ;;  %v4572_v22 = vld [vmem:[#allocation5 + $0x998] sm:$0xf] }
  0xb9   : > { %2823 = vmatpush.bf16.msra.mxu3 %v4021_v35  ;;  %v4669_v35 = vor.u32 %v5212_v26, %v4668_v25  ;;  %v4861_v42 = vor.u32 %v5260_v30, %v4860_v29  ;;  %v4764_v24 = vld [vmem:[#allocation5 + $0xb18] sm:$0xf]  ;;  %v5236_v25 = vld [vmem:[#allocation5 + $0xb2c] sm:$0xf0]  ;;  %v4189_v26 = vor.u32 %v5092_v15, %v4188_v12  ;;  %v4164_v30 = vld [vmem:[#allocation5 + $0x668] sm:$0xf] }
  0xba   : > { %2785 = vmatpush.bf16.msra.mxu0 %v3421_v44  ;;  %v4644_v44 = vld [vmem:[#allocation5 + $0xa28] sm:$0xf]  ;;  %v3518_v15 = vld [vmem:[#allocation5 + $0x170] sm:$0xf0] }
  0xbb   : > { %2798 = vmatpush.bf16.msra.mxu1 %v3613_v45  ;;  %v5206_v45 = vld [vmem:[#allocation5 + $0xa3c] sm:$0xf0]  ;;  %v4692_v12 = vld [vmem:[#allocation5 + $0xa88] sm:$0xf] }
  0xbc   : > { %2811 = vmatpush.bf16.msra.mxu2 %v3805_v46  ;;  %v4836_v46 = vld [vmem:[#allocation5 + $0xba8] sm:$0xf] }
  0xbd   : > { %2824 = vmatpush.bf16.msra.mxu3 %v3997_v50  ;;  %v4645_v50 = vor.u32 %v5206_v45, %v4644_v44  ;;  %v4837_v54 = vor.u32 %v5254_v47, %v4836_v46 }
  0xbe   : > { %2786 = vmatpush.bf16.msra.mxu0 %v3397_v56  ;;  %v4620_v56 = vld [vmem:[#allocation5 + $0x9f8] sm:$0xf] }
  0xbf   : > { %2799 = vmatpush.bf16.msra.mxu1 %v3589_v57  ;;  %v5200_v57 = vld [vmem:[#allocation5 + $0xa0c] sm:$0xf0] }
  0xc0   : > { %2812 = vmatpush.bf16.msra.mxu2 %v3781_v58  ;;  %v4812_v58 = vld [vmem:[#allocation5 + $0xb78] sm:$0xf]  ;;  %v4621_v0 = vor.u32 %v5200_v57, %v4620_v56  ;;  %v5176_v56 = vld [vmem:[#allocation5 + $0x94c] sm:$0xf0] }
  0xc1   : > { %2825 = vmatpush.bf16.msra.mxu3 %v3973_v62  ;;  %v4429_v62 = vor.u32 %v5152_v55, %v4428_v53  ;;  %v4813_v4 = vor.u32 %v5248_v59, %v4812_v58  ;;  %v4524_v55 = vld [vmem:[#allocation5 + $0x938] sm:$0xf]  ;;  %v5224_v59 = vld [vmem:[#allocation5 + $0xacc] sm:$0xf0] }
  0xc2   : > { %2787 = vmatpush.bf16.msra.mxu0 %v3373_v5  ;;  %v4596_v5 = vld [vmem:[#allocation5 + $0x9c8] sm:$0xf]  ;;  %v4716_v58 = vld [vmem:[#allocation5 + $0xab8] sm:$0xf] }
  0xc3   : > { %2800 = vmatpush.bf16.msra.mxu1 %v3565_v8  ;;  %v4788_v8 = vld [vmem:[#allocation5 + $0xb48] sm:$0xf] }
  0xc4   : > { %2813 = vmatpush.bf16.msra.mxu2 %v3757_v10  ;;  %v5242_v10 = vld [vmem:[#allocation5 + $0xb5c] sm:$0xf0] }
  0xc5   : > { %2826 = vmatpush.bf16.msra.mxu3 %v3949_v14  ;;  %v4597_v14 = vor.u32 %v5194_v6, %v4596_v5  ;;  %v4789_v20 = vor.u32 %v5242_v10, %v4788_v8  ;;  %v4308_v5 = vld [vmem:[#allocation5 + $0x788] sm:$0xf]  ;;  %v5122_v6 = vld [vmem:[#allocation5 + $0x79c] sm:$0xf0]  ;;  %v4717_v10 = vor.u32 %v5224_v59, %v4716_v58  ;;  %v4046_v58 = vld [vmem:[#allocation5 + $0x590] sm:$0xf0] }
  0xc6   : > { %2788 = vmatpush.bf16.msra.mxu0 %v3349_v23  ;;  %v5188_v23 = vld [vmem:[#allocation5 + $0x9ac] sm:$0xf0]  ;;  %v4500_v8 = vld [vmem:[#allocation5 + $0x908] sm:$0xf] }
  0xc7   : > { %2801 = vmatpush.bf16.msra.mxu1 %v3541_v27  ;;  %v2582_v27 = vpop.f32.mrf.mxu0  ;;  %v4573_v29 = vor.u32 %v5188_v23, %v4572_v22  ;;  %v2595_v44 = vpop.f32.mrf.mxu1  ;;  %v3710_v22 = vld [vmem:[#allocation5 + $0x2f0] sm:$0xf0]  ;;  %v5017_v23 = vld [vmem:[#allocation5 + $0x45c] sm:$0xf] }
  0xc8   : > { %2814 = vmatpush.bf16.msra.mxu2 %v3733_v28  ;;  %v4381_v28 = vor.u32 %v5140_v21, %v4380_v18  ;;  %v4969_v18 = vld [vmem:[#allocation5 + $0x2dc] sm:$0xf] }
  0xc9   : > { %2827 = vmatpush.bf16.msra.mxu3 %v3925_v31  ;;  %2789 = vmatmul.bf16.vlgmr.msra.gmra.mxu0 %v5665_v9  ;;  %v5086_v31 = vld [vmem:[#allocation5 + $0x67c] sm:$0xf0] }
  0xca   : > { %2833 = vmatpush.bf16.msrb.mxu0 %v4285_v32  ;;  %2802 = vmatmul.bf16.vlgmr.msra.gmra.mxu1 %v5671_v17  ;;  %v4356_v32 = vld [vmem:[#allocation5 + $0x7e8] sm:$0xf]  ;;  %v4165_v46 = vor.u32 %v5086_v31, %v4164_v30  ;;  %v3713_v31 = vor.u32 %v4969_v18, %v3710_v22  ;;  %v3422_v18 = vld [vmem:[#allocation5 + $0xb0] sm:$0xf0] }
  0xcb   : > { %2846 = vmatpush.bf16.msrb.mxu1 %v4477_v33  ;;  %2815 = vmatmul.bf16.vlgmr.msra.gmra.mxu2 %v5661_v63  ;;  %v2583_v33 = vadd.f32 %v2582_v27, %v641_v19  ;;  %v5065_v27 = vld [vmem:[#allocation5 + $0x5dc] sm:$0xf]  ;;  %v3614_v22 = vld [vmem:[#allocation5 + $0x230] sm:$0xf0] }
  0xcc   : > { %2859 = vmatpush.bf16.msrb.mxu2 %v4669_v35  ;;  %2828 = vmatmul.bf16.vlgmr.msra.gmra.mxu3 %v5669_v16  ;;  %v4765_v35 = vor.u32 %v5236_v25, %v4764_v24  ;;  %v3902_v24 = vld [vmem:[#allocation5 + $0x470] sm:$0xf0]  ;;  %v4309_v25 = vor.u32 %v5122_v6, %v4308_v5  ;;  %v4999_v5 = vld [vmem:[#allocation5 + $0x3cc] sm:$0xf]  ;;  %v3830_v6 = vld [vmem:[#allocation5 + $0x3e0] sm:$0xf0] }
  0xcd   : > { %2872 = vmatpush.bf16.msrb.mxu3 %v4861_v42  ;;  %v4740_v42 = vld [vmem:[#allocation5 + $0xae8] sm:$0xf]  ;;  %v2596_v47 = vadd.f32 %v2595_v44, %v2583_v33  ;;  %v4915_v33 = vld [vmem:[#allocation5 + $0x12c] sm:$0xf]  ;;  %v3878_v44 = vld [vmem:[#allocation5 + $0x440] sm:$0xf0] }
  0xce   : > { %2834 = vmatpush.bf16.msrb.mxu0 %v4261_v48  ;;  %v2608_v45 = vpop.f32.mrf.mxu2  ;;  %v4357_v48 = vor.u32 %v5134_v36, %v4356_v32  ;;  %v4741_v53 = vor.u32 %v5230_v43, %v4740_v42  ;;  %v3905_v32 = vor.u32 %v5017_v23, %v3902_v24  ;;  %v4963_v36 = vld [vmem:[#allocation5 + $0x2ac] sm:$0xf]  ;;  %v3686_v42 = vld [vmem:[#allocation5 + $0x2c0] sm:$0xf0]  ;;  %v4993_v23 = vld [vmem:[#allocation5 + $0x39c] sm:$0xf] }
  0xcf   : > { %2847 = vmatpush.bf16.msrb.mxu1 %v4453_v49  ;;  %v4549_v49 = vor.u32 %v5182_v41, %v4548_v39  ;;  %v2609_v57 = vadd.f32 %v2608_v45, %v2596_v47  ;;  %v2584_v2 = vpop.f32.mrf.mxu0  ;;  %v2597_v19 = vpop.f32.mrf.mxu1  ;;  %v5011_v43 = vld [vmem:[#allocation5 + $0x42c] sm:$0xf]  ;;  %v3806_v24 = vld [vmem:[#allocation5 + $0x3b0] sm:$0xf0] }
  0xd0   : > { %2860 = vmatpush.bf16.msrb.mxu2 %v4645_v50  ;;  %v4140_v50 = vld [vmem:[#allocation5 + $0x638] sm:$0xf]  ;;  %v5059_v45 = vld [vmem:[#allocation5 + $0x5ac] sm:$0xf]  ;;  %v4945_v19 = vld [vmem:[#allocation5 + $0x21c] sm:$0xf] }
  0xd1   : > { %2873 = vmatpush.bf16.msrb.mxu3 %v4837_v54  ;;  %v5128_v54 = vld [vmem:[#allocation5 + $0x7cc] sm:$0xf0]  ;;  %v4141_v61 = vor.u32 %v5080_v51, %v4140_v50  ;;  %v4909_v50 = vld [vmem:[#allocation5 + $0xfc] sm:$0xf]  ;;  %v3470_v51 = vld [vmem:[#allocation5 + $0x110] sm:$0xf0] }
  0xd2   : > { %2835 = vmatpush.bf16.msrb.mxu0 %v4237_v60  ;;  %v2621_v60 = vpop.f32.mrf.mxu3  ;;  %v4333_v3 = vor.u32 %v5128_v54, %v4332_v52  ;;  %v4957_v52 = vld [vmem:[#allocation5 + $0x27c] sm:$0xf]  ;;  %v3662_v54 = vld [vmem:[#allocation5 + $0x290] sm:$0xf0]  ;;  %v3473_v59 = vor.u32 %v4909_v50, %v3470_v51  ;;  %v4951_v2 = vld [vmem:[#allocation5 + $0x24c] sm:$0xf] }
  0xd3   : > { %2848 = vmatpush.bf16.msrb.mxu1 %v4429_v62  ;;  %v4116_v62 = vld [vmem:[#allocation5 + $0x608] sm:$0xf]  ;;  %v5707_v1 = vadd.f32 %v2621_v60, %v2609_v57  ;;  %v5053_v57 = vld [vmem:[#allocation5 + $0x57c] sm:$0xf]  ;;  %v3665_v60 = vor.u32 %v4957_v52, %v3662_v54  ;;  %v3374_v50 = vld [vmem:[#allocation5 + $0x50] sm:$0xf0] }
  0xd4   : > { %2861 = vmatpush.bf16.msrb.mxu2 %v4621_v0  ;;  %v5074_v0 = vld [vmem:[#allocation5 + $0x61c] sm:$0xf0]  ;;  %v4933_v51 = vld [vmem:[#allocation5 + $0x1bc] sm:$0xf]  ;;  %v3566_v54 = vld [vmem:[#allocation5 + $0x1d0] sm:$0xf0] }
  0xd5   : > { %2874 = vmatpush.bf16.msrb.mxu3 %v4813_v4  ;;  %v4525_v4 = vor.u32 %v5176_v56, %v4524_v55  ;;  %v4117_v21 = vor.u32 %v5074_v0, %v4116_v62  ;;  %v5005_v55 = vld [vmem:[#allocation5 + $0x3fc] sm:$0xf]  ;;  %v3854_v56 = vld [vmem:[#allocation5 + $0x410] sm:$0xf0]  ;;  %v4903_v62 = vld [vmem:[#allocation5 + $0xcc] sm:$0xf] }
  0xd6   : > { %2836 = vmatpush.bf16.msrb.mxu0 %v4213_v11  ;;  %v5170_v11 = vld [vmem:[#allocation5 + $0x91c] sm:$0xf0]  ;;  %v3446_v0 = vld [vmem:[#allocation5 + $0xe0] sm:$0xf0] }
  0xd7   : > { %2849 = vmatpush.bf16.msrb.mxu1 %v4405_v13  ;;  %v5218_v13 = vld [vmem:[#allocation5 + $0xa9c] sm:$0xf0] }
  0xd8   : > { %2862 = vmatpush.bf16.msrb.mxu2 %v4597_v14  ;;  %v4921_v14 = vld [vmem:[#allocation5 + $0x15c] sm:$0xf] }
  0xd9   : > { %2875 = vmatpush.bf16.msrb.mxu3 %v4789_v20  ;;  %v2610_v20 = vpop.f32.mrf.mxu2  ;;  %v3521_v30 = vor.u32 %v4921_v14, %v3518_v15  ;;  %v3833_v14 = vor.u32 %v4999_v5, %v3830_v6  ;;  %v4897_v15 = vld [vmem:[#allocation5 + $0x9c] sm:$0xf] }
  0xda   : > { %2837 = vmatpush.bf16.msrb.mxu0 %v4189_v26  ;;  %v4501_v26 = vor.u32 %v5170_v11, %v4500_v8  ;;  %v2623_v39 = vpop.f32.mrf.mxu3  ;;  %v5047_v8 = vld [vmem:[#allocation5 + $0x54c] sm:$0xf]  ;;  %v3449_v11 = vor.u32 %v4903_v62, %v3446_v0  ;;  %v3569_v62 = vor.u32 %v4933_v51, %v3566_v54  ;;  %v4238_v51 = vld [vmem:[#allocation5 + $0x710] sm:$0xf0] }
  0xdb   : > { %2850 = vmatpush.bf16.msrb.mxu1 %v4381_v28  ;;  %v4094_v28 = vld [vmem:[#allocation5 + $0x5f0] sm:$0xf0]  ;;  %v4987_v39 = vld [vmem:[#allocation5 + $0x36c] sm:$0xf] }
  0xdc   : > { %2863 = vmatpush.bf16.msrb.mxu2 %v4573_v29  ;;  %v4693_v29 = vor.u32 %v5218_v13, %v4692_v12  ;;  %v4097_v41 = vor.u32 %v5065_v27, %v4094_v28  ;;  %v3425_v27 = vor.u32 %v4897_v15, %v3422_v18  ;;  %v3617_v28 = vor.u32 %v4945_v19, %v3614_v22  ;;  %v4286_v15 = vld [vmem:[#allocation5 + $0x770] sm:$0xf0]  ;;  %v5161_v18 = vld [vmem:[#allocation5 + $0x8dc] sm:$0xf] }
  0xdd   : > { %2876 = vmatpush.bf16.msrb.mxu3 %v4765_v35  ;;  %v3494_v35 = vld [vmem:[#allocation5 + $0x140] sm:$0xf0]  ;;  %v5209_v22 = vld [vmem:[#allocation5 + $0xa5c] sm:$0xf]  ;;  %v4430_v54 = vld [vmem:[#allocation5 + $0x890] sm:$0xf0] }
  0xde   : > { %2838 = vmatpush.bf16.msrb.mxu0 %v4165_v46  ;;  %v4070_v46 = vld [vmem:[#allocation5 + $0x5c0] sm:$0xf0]  ;;  %v3497_v47 = vor.u32 %v4915_v33, %v3494_v35 }
  0xdf   : > { %2851 = vmatpush.bf16.msrb.mxu1 %v4357_v48  ;;  %v3689_v48 = vor.u32 %v4963_v36, %v3686_v42  ;;  %v3590_v36 = vld [vmem:[#allocation5 + $0x200] sm:$0xf0] }
  0xe0   : > { %2864 = vmatpush.bf16.msrb.mxu2 %v4549_v49  ;;  %v3881_v49 = vor.u32 %v5011_v43, %v3878_v44  ;;  %v5035_v43 = vld [vmem:[#allocation5 + $0x4ec] sm:$0xf]  ;;  %v3974_v44 = vld [vmem:[#allocation5 + $0x500] sm:$0xf0] }
  0xe1   : > { %2877 = vmatpush.bf16.msrb.mxu3 %v4741_v53  ;;  %v4073_v53 = vor.u32 %v5059_v45, %v4070_v46 }
  0xe2   : > { %2839 = vmatpush.bf16.msrb.mxu0 %v4141_v61  ;;  %v3857_v61 = vor.u32 %v5005_v55, %v3854_v56  ;;  %v4981_v55 = vld [vmem:[#allocation5 + $0x33c] sm:$0xf]  ;;  %v3758_v56 = vld [vmem:[#allocation5 + $0x350] sm:$0xf0] }
  0xe3   : > { %2852 = vmatpush.bf16.msrb.mxu1 %v4333_v3  ;;  %v4049_v3 = vor.u32 %v5053_v57, %v4046_v58  ;;  %v5029_v57 = vld [vmem:[#allocation5 + $0x4bc] sm:$0xf]  ;;  %v3950_v58 = vld [vmem:[#allocation5 + $0x4d0] sm:$0xf0]  ;;  %v3761_v0 = vor.u32 %v4981_v55, %v3758_v56 }
  0xe4   : > { %2865 = vmatpush.bf16.msrb.mxu2 %v4525_v4  ;;  %v3638_v4 = vld [vmem:[#allocation5 + $0x260] sm:$0xf0]  ;;  %v3953_v6 = vor.u32 %v5029_v57, %v3950_v58  ;;  %v5197_v55 = vld [vmem:[#allocation5 + $0x9fc] sm:$0xf]  ;;  %v4622_v56 = vld [vmem:[#allocation5 + $0xa10] sm:$0xf0] }
  0xe5   : > { %2878 = vmatpush.bf16.msrb.mxu3 %v4717_v10  ;;  %v4022_v10 = vld [vmem:[#allocation5 + $0x560] sm:$0xf0]  ;;  %v3641_v13 = vor.u32 %v4951_v2, %v3638_v4  ;;  %v4927_v2 = vld [vmem:[#allocation5 + $0x18c] sm:$0xf]  ;;  %v5245_v57 = vld [vmem:[#allocation5 + $0xb7c] sm:$0xf] }
  0xe6   : > { %2840 = vmatpush.bf16.msrb.mxu0 %v4117_v21  ;;  %v5713_v12 = vpop.f32.mrf.mxu0  ;;  %v4025_v21 = vor.u32 %v5047_v8, %v4022_v10  ;;  %v4975_v4 = vld [vmem:[#allocation5 + $0x30c] sm:$0xf]  ;;  %v3734_v8 = vld [vmem:[#allocation5 + $0x320] sm:$0xf0]  ;;  %v4814_v58 = vld [vmem:[#allocation5 + $0xb90] sm:$0xf0] }
  0xe7   : > { %2853 = vmatpush.bf16.msrb.mxu1 %v4309_v25  ;;  %v5715_v20 = vpop.f32.mrf.mxu1  ;;  %v5041_v25 = vld [vmem:[#allocation5 + $0x51c] sm:$0xf]  ;;  %v5023_v10 = vld [vmem:[#allocation5 + $0x48c] sm:$0xf] }
  0xe8   : > { %2866 = vmatpush.bf16.msrb.mxu2 %v4501_v26  ;;  %v3998_v26 = vld [vmem:[#allocation5 + $0x530] sm:$0xf0] }
  0xe9   : > { %2879 = vmatpush.bf16.msrb.mxu3 %v4693_v29  ;;  %2841 = vmatmul.bf16.vlgmr.msrb.gmra.mxu0 %v5682_v37  ;;  %v3809_v29 = vor.u32 %v4993_v23, %v3806_v24  ;;  %v4001_v35 = vor.u32 %v5041_v25, %v3998_v26  ;;  %v4670_v23 = vld [vmem:[#allocation5 + $0xa70] sm:$0xf0]  ;;  %v3737_v25 = vor.u32 %v4975_v4, %v3734_v8  ;;  %v5257_v26 = vld [vmem:[#allocation5 + $0xbdc] sm:$0xf]  ;;  %v4406_v4 = vld [vmem:[#allocation5 + $0x860] sm:$0xf0] }
  0xea   : > { %2885 = vmatpush.bf16.msra.mxu0 %v3521_v30  ;;  %2854 = vmatmul.bf16.vlgmr.msrb.gmra.mxu1 %v5686_v40  ;;  %v4891_v30 = vld [vmem:[#allocation5 + $0x6c] sm:$0xf] }
  0xeb   : > { %2898 = vmatpush.bf16.msra.mxu1 %v3713_v31  ;;  %2867 = vmatmul.bf16.vlgmr.msrb.gmra.mxu2 %v5680_v34  ;;  %v3398_v31 = vld [vmem:[#allocation5 + $0x80] sm:$0xf0]  ;;  %v5239_v8 = vld [vmem:[#allocation5 + $0xb4c] sm:$0xf] }
  0xec   : > { %2911 = vmatpush.bf16.msra.mxu2 %v3905_v32  ;;  %2880 = vmatmul.bf16.vlgmr.msrb.gmra.mxu3 %v5684_v38  ;;  %v4939_v32 = vld [vmem:[#allocation5 + $0x1ec] sm:$0xf]  ;;  %v3401_v45 = vor.u32 %v4891_v30, %v3398_v31  ;;  %v4673_v31 = vor.u32 %v5209_v22, %v4670_v23 }
  0xed   : > { %2924 = vmatpush.bf16.msra.mxu3 %v4097_v41  ;;  %v3782_v41 = vld [vmem:[#allocation5 + $0x380] sm:$0xf0] }
  0xee   : > { %2886 = vmatpush.bf16.msra.mxu0 %v3497_v47  ;;  %v5717_v33 = vpop.f32.mrf.mxu2  ;;  %v2636_v46 = vpop.f32.mrf.mxu0  ;;  %v3593_v47 = vor.u32 %v4939_v32, %v3590_v36  ;;  %v5107_v32 = vld [vmem:[#allocation5 + $0x72c] sm:$0xf] }
  0xef   : > { %2899 = vmatpush.bf16.msra.mxu1 %v3689_v48  ;;  %v5719_v42 = vpop.f32.mrf.mxu3  ;;  %v3785_v48 = vor.u32 %v4987_v39, %v3782_v41  ;;  %v2649_v52 = vpop.f32.mrf.mxu1  ;;  %v5155_v36 = vld [vmem:[#allocation5 + $0x8ac] sm:$0xf]  ;;  %v4454_v41 = vld [vmem:[#allocation5 + $0x8c0] sm:$0xf0] }
  0xf0   : > { %2912 = vmatpush.bf16.msra.mxu2 %v3881_v49  ;;  %v4885_v49 = vld [vmem:[#allocation5 + $0x3c] sm:$0xf]  ;;  %v4838_v46 = vld [vmem:[#allocation5 + $0xbc0] sm:$0xf0] }
  0xf1   : > { %2925 = vmatpush.bf16.msra.mxu3 %v4073_v53  ;;  %v3977_v53 = vor.u32 %v5035_v43, %v3974_v44  ;;  %v5203_v43 = vld [vmem:[#allocation5 + $0xa2c] sm:$0xf]  ;;  %v4646_v44 = vld [vmem:[#allocation5 + $0xa40] sm:$0xf0]  ;;  %v5149_v52 = vld [vmem:[#allocation5 + $0x87c] sm:$0xf] }
  0xf2   : > { %2887 = vmatpush.bf16.msra.mxu0 %v3473_v59  ;;  %v3377_v59 = vor.u32 %v4885_v49, %v3374_v50  ;;  %v4649_v49 = vor.u32 %v5203_v43, %v4646_v44  ;;  %v5101_v50 = vld [vmem:[#allocation5 + $0x6fc] sm:$0xf]  ;;  %v4358_v43 = vld [vmem:[#allocation5 + $0x800] sm:$0xf0]  ;;  %v5179_v44 = vld [vmem:[#allocation5 + $0x96c] sm:$0xf] }
  0xf3   : > { %2900 = vmatpush.bf16.msra.mxu1 %v3665_v60  ;;  %v4879_v60 = vld [vmem:[#allocation5 + $0xc] sm:$0xf] }
  0xf4   : > { %2913 = vmatpush.bf16.msra.mxu2 %v3857_v61  ;;  %v3350_v61 = vld [vmem:[#allocation5 + $0x20] sm:$0xf0] }
  0xf5   : > { %2926 = vmatpush.bf16.msra.mxu3 %v4049_v3  ;;  %v3542_v3 = vld [vmem:[#allocation5 + $0x1a0] sm:$0xf0]  ;;  %v3353_v19 = vor.u32 %v4879_v60, %v3350_v61  ;;  %v4433_v60 = vor.u32 %v5149_v52, %v4430_v54  ;;  %v4625_v61 = vor.u32 %v5197_v55, %v4622_v56  ;;  %v4142_v54 = vld [vmem:[#allocation5 + $0x650] sm:$0xf0]  ;;  %v5125_v55 = vld [vmem:[#allocation5 + $0x7bc] sm:$0xf] }
  0xf6   : > { %2888 = vmatpush.bf16.msra.mxu0 %v3449_v11  ;;  %v2662_v5 = vpop.f32.mrf.mxu2  ;;  %v3926_v11 = vld [vmem:[#allocation5 + $0x4a0] sm:$0xf0]  ;;  %v3545_v24 = vor.u32 %v4927_v2, %v3542_v3  ;;  %v5143_v2 = vld [vmem:[#allocation5 + $0x84c] sm:$0xf]  ;;  %v4817_v3 = vor.u32 %v5245_v57, %v4814_v58  ;;  %v4334_v58 = vld [vmem:[#allocation5 + $0x7d0] sm:$0xf0] }
  0xf7   : > { %2901 = vmatpush.bf16.msra.mxu1 %v3641_v13  ;;  %v2675_v13 = vpop.f32.mrf.mxu3  ;;  %v5191_v5 = vld [vmem:[#allocation5 + $0x9cc] sm:$0xf] }
  0xf8   : > { %2914 = vmatpush.bf16.msra.mxu2 %v3833_v14  ;;  %v5113_v14 = vld [vmem:[#allocation5 + $0x75c] sm:$0xf] }
  0xf9   : > { %2927 = vmatpush.bf16.msra.mxu3 %v4025_v21  ;;  %v4478_v21 = vld [vmem:[#allocation5 + $0x8f0] sm:$0xf0] }
  0xfa   : > { %2889 = vmatpush.bf16.msra.mxu0 %v3425_v27  ;;  %v4862_v27 = vld [vmem:[#allocation5 + $0xbf0] sm:$0xf0]  ;;  %v4481_v30 = vor.u32 %v5161_v18, %v4478_v21  ;;  %v5089_v18 = vld [vmem:[#allocation5 + $0x69c] sm:$0xf] }
  0xfb   : > { %2902 = vmatpush.bf16.msra.mxu1 %v3617_v28  ;;  %v3929_v28 = vor.u32 %v5023_v10, %v3926_v11  ;;  %v4865_v39 = vor.u32 %v5257_v26, %v4862_v27  ;;  %v4790_v10 = vld [vmem:[#allocation5 + $0xb60] sm:$0xf0]  ;;  %v5137_v21 = vld [vmem:[#allocation5 + $0x81c] sm:$0xf]  ;;  %v4574_v26 = vld [vmem:[#allocation5 + $0x9b0] sm:$0xf0] }
  0xfc   : > { %2915 = vmatpush.bf16.msra.mxu2 %v3809_v29  ;;  %v4289_v29 = vor.u32 %v5113_v14, %v4286_v15  ;;  %v4409_v14 = vor.u32 %v5143_v2, %v4406_v4  ;;  %v4793_v23 = vor.u32 %v5239_v8, %v4790_v10  ;;  %v5233_v27 = vld [vmem:[#allocation5 + $0xb1c] sm:$0xf]  ;;  %v4118_v4 = vld [vmem:[#allocation5 + $0x620] sm:$0xf0]  ;;  %v5119_v8 = vld [vmem:[#allocation5 + $0x78c] sm:$0xf] }
  0xfd   : > { %2928 = vmatpush.bf16.msra.mxu3 %v4001_v35  ;;  %v4262_v35 = vld [vmem:[#allocation5 + $0x740] sm:$0xf0] }
  0xfe   : > { %2890 = vmatpush.bf16.msra.mxu0 %v3401_v45  ;;  %v5251_v45 = vld [vmem:[#allocation5 + $0xbac] sm:$0xf]  ;;  %v4310_v10 = vld [vmem:[#allocation5 + $0x7a0] sm:$0xf0] }
  0xff   : > { %2903 = vmatpush.bf16.msra.mxu1 %v3593_v47  ;;  %v4265_v47 = vor.u32 %v5107_v32, %v4262_v35  ;;  %v5083_v32 = vld [vmem:[#allocation5 + $0x66c] sm:$0xf]  ;;  %v4166_v35 = vld [vmem:[#allocation5 + $0x680] sm:$0xf0] }
 0x100   : > { %2916 = vmatpush.bf16.msra.mxu2 %v3785_v48  ;;  %v4457_v48 = vor.u32 %v5155_v36, %v4454_v41  ;;  %v5131_v36 = vld [vmem:[#allocation5 + $0x7ec] sm:$0xf] }
 0x101   : > { %2929 = vmatpush.bf16.msra.mxu3 %v3977_v53  ;;  %v4841_v53 = vor.u32 %v5251_v45, %v4838_v46  ;;  %v4550_v45 = vld [vmem:[#allocation5 + $0x980] sm:$0xf0] }
 0x102   : > { %2891 = vmatpush.bf16.msra.mxu0 %v3377_v59  ;;  %v4241_v59 = vor.u32 %v5101_v50, %v4238_v51  ;;  %v4361_v51 = vor.u32 %v5131_v36, %v4358_v43  ;;  %v4553_v52 = vor.u32 %v5179_v44, %v4550_v45  ;;  %v5069_v36 = vld [vmem:[#allocation5 + $0x5f4] sm:$0xf0] }
 0x103   : > { %2904 = vmatpush.bf16.msra.mxu1 %v3569_v62  ;;  %v5095_v62 = vld [vmem:[#allocation5 + $0x6cc] sm:$0xf] }
 0x104   : > { %2917 = vmatpush.bf16.msra.mxu2 %v3761_v0  ;;  %v4214_v0 = vld [vmem:[#allocation5 + $0x6e0] sm:$0xf0] }
 0x105   : > { %2930 = vmatpush.bf16.msra.mxu3 %v3953_v6  ;;  %v4598_v6 = vld [vmem:[#allocation5 + $0x9e0] sm:$0xf0]  ;;  %v4217_v11 = vor.u32 %v5095_v62, %v4214_v0  ;;  %v4718_v62 = vld [vmem:[#allocation5 + $0xad0] sm:$0xf0]  ;;  %v642_v0 = vperm.slane %v5704_v7, 1 }
 0x106   : > { %2892 = vmatpush.bf16.msra.mxu0 %v3353_v19  ;;  %v5725_v13 = vpop.f32.mrf.mxu0  ;;  %v4601_v15 = vor.u32 %v5191_v5, %v4598_v6  ;;  %v4190_v19 = vld [vmem:[#allocation5 + $0x6b0] sm:$0xf0]  ;;  %v4337_v5 = vor.u32 %v5125_v55, %v4334_v58  ;;  %v5063_v55 = vld [vmem:[#allocation5 + $0x5c4] sm:$0xf0] }
 0x107   : > { %2905 = vmatpush.bf16.msra.mxu1 %v3545_v24  ;;  %v5727_v22 = vpop.f32.mrf.mxu1  ;;  %v4382_v24 = vld [vmem:[#allocation5 + $0x830] sm:$0xf0]  ;;  %v2687_v7 = vadd.f32 %v5725_v13, %v642_v0  ;;  %v4961_v0 = vld [vmem:[#allocation5 + $0x294] sm:$0xf0] }
 0x108   : > { %2918 = vmatpush.bf16.msra.mxu2 %v3737_v25  ;;  %v5185_v25 = vld [vmem:[#allocation5 + $0x99c] sm:$0xf] }
 0x109   : > { %2931 = vmatpush.bf16.msra.mxu3 %v3929_v28  ;;  %2893 = vmatmul.bf16.vlgmr.msra.gmra.mxu0 %v5665_v9  ;;  %v4766_v28 = vld [vmem:[#allocation5 + $0xb30] sm:$0xf0]  ;;  %v2700_v44 = vadd.f32 %v5727_v22, %v2687_v7  ;;  %v5003_v7 = vld [vmem:[#allocation5 + $0x3e4] sm:$0xf0] }
 0x10a   : > { %2937 = vmatpush.bf16.msrb.mxu0 %v4289_v29  ;;  %2906 = vmatmul.bf16.vlgmr.msra.gmra.mxu1 %v5671_v17  ;;  %v4193_v29 = vor.u32 %v5089_v18, %v4190_v19  ;;  %v4769_v41 = vor.u32 %v5233_v27, %v4766_v28  ;;  %v4502_v18 = vld [vmem:[#allocation5 + $0x920] sm:$0xf0]  ;;  %v5215_v19 = vld [vmem:[#allocation5 + $0xa8c] sm:$0xf]  ;;  %v4973_v28 = vld [vmem:[#allocation5 + $0x2f4] sm:$0xf0] }
 0x10b   : > { %2950 = vmatpush.bf16.msrb.mxu1 %v4481_v30  ;;  %2919 = vmatmul.bf16.vlgmr.msra.gmra.mxu2 %v5661_v63  ;;  %v4385_v30 = vor.u32 %v5137_v21, %v4382_v24  ;;  %v4694_v21 = vld [vmem:[#allocation5 + $0xaa0] sm:$0xf0]  ;;  %v3524_v24 = vld [vmem:[#allocation5 + $0x160] sm:$0xf] }
 0x10c   : > { %2963 = vmatpush.bf16.msrb.mxu2 %v4673_v31  ;;  %2932 = vmatmul.bf16.vlgmr.msra.gmra.mxu3 %v5669_v16  ;;  %v4577_v31 = vor.u32 %v5185_v25, %v4574_v26  ;;  %v4925_v25 = vld [vmem:[#allocation5 + $0x174] sm:$0xf0]  ;;  %v3716_v26 = vld [vmem:[#allocation5 + $0x2e0] sm:$0xf] }
 0x10d   : > { %2976 = vmatpush.bf16.msrb.mxu3 %v4865_v39  ;;  %v3525_v43 = vor.u32 %v4925_v25, %v3524_v24  ;;  %v3717_v13 = vor.u32 %v4973_v28, %v3716_v26  ;;  %v4028_v24 = vld [vmem:[#allocation5 + $0x550] sm:$0xf] }
 0x10e   : > { %2938 = vmatpush.bf16.msrb.mxu0 %v4265_v47  ;;  %v5729_v39 = vpop.f32.mrf.mxu2  ;;  %v5227_v47 = vld [vmem:[#allocation5 + $0xaec] sm:$0xf]  ;;  %v2688_v50 = vpop.f32.mrf.mxu0 }
 0x10f   : > { %2951 = vmatpush.bf16.msrb.mxu1 %v4457_v48  ;;  %v5731_v46 = vpop.f32.mrf.mxu3  ;;  %v4742_v48 = vld [vmem:[#allocation5 + $0xb00] sm:$0xf0]  ;;  %v2701_v56 = vpop.f32.mrf.mxu1  ;;  %v2713_v22 = vadd.f32 %v5729_v39, %v2700_v44  ;;  %v2635_v39 = vadd.f32 %v5713_v12, %v5707_v1  ;;  %v5051_v1 = vld [vmem:[#allocation5 + $0x564] sm:$0xf0] }
 0x110   : > { %2964 = vmatpush.bf16.msrb.mxu2 %v4649_v49  ;;  %v4169_v49 = vor.u32 %v5083_v32, %v4166_v35  ;;  %v4745_v57 = vor.u32 %v5227_v47, %v4742_v48  ;;  %v4100_v35 = vld [vmem:[#allocation5 + $0x5e0] sm:$0xf]  ;;  %v3500_v47 = vld [vmem:[#allocation5 + $0x130] sm:$0xf]  ;;  %v4919_v48 = vld [vmem:[#allocation5 + $0x144] sm:$0xf0] }
 0x111   : > { %2977 = vmatpush.bf16.msrb.mxu3 %v4841_v53  ;;  %v5077_v53 = vld [vmem:[#allocation5 + $0x63c] sm:$0xf]  ;;  %v4101_v50 = vor.u32 %v5069_v36, %v4100_v35  ;;  %v3501_v56 = vor.u32 %v4919_v48, %v3500_v47  ;;  %v2648_v12 = vadd.f32 %v5715_v20, %v2635_v39  ;;  %v4029_v35 = vor.u32 %v5051_v1, %v4028_v24  ;;  %v4949_v36 = vld [vmem:[#allocation5 + $0x234] sm:$0xf0]  ;;  %v4004_v20 = vld [vmem:[#allocation5 + $0x520] sm:$0xf] }
 0x112   : > { %2939 = vmatpush.bf16.msrb.mxu0 %v4241_v59  ;;  %v5173_v59 = vld [vmem:[#allocation5 + $0x93c] sm:$0xf]  ;;  %v4145_v2 = vor.u32 %v5077_v53, %v4142_v54  ;;  %v5015_v53 = vld [vmem:[#allocation5 + $0x444] sm:$0xf0]  ;;  %v4076_v54 = vld [vmem:[#allocation5 + $0x5b0] sm:$0xf] }
 0x113   : > { %2952 = vmatpush.bf16.msrb.mxu1 %v4433_v60  ;;  %v4526_v60 = vld [vmem:[#allocation5 + $0x950] sm:$0xf0]  ;;  %v3572_v39 = vld [vmem:[#allocation5 + $0x1c0] sm:$0xf]  ;;  %v3548_v1 = vld [vmem:[#allocation5 + $0x190] sm:$0xf] }
 0x114   : > { %2965 = vmatpush.bf16.msrb.mxu2 %v4625_v61  ;;  %v5221_v61 = vld [vmem:[#allocation5 + $0xabc] sm:$0xf]  ;;  %v4529_v6 = vor.u32 %v5173_v59, %v4526_v60  ;;  %v3476_v59 = vld [vmem:[#allocation5 + $0x100] sm:$0xf]  ;;  %v4913_v60 = vld [vmem:[#allocation5 + $0x114] sm:$0xf0] }
 0x115   : > { %2978 = vmatpush.bf16.msrb.mxu3 %v4817_v3  ;;  %v5071_v3 = vld [vmem:[#allocation5 + $0x60c] sm:$0xf] }
 0x116   : > { %2940 = vmatpush.bf16.msrb.mxu0 %v4217_v11  ;;  %v5167_v11 = vld [vmem:[#allocation5 + $0x90c] sm:$0xf]  ;;  %v4121_v27 = vor.u32 %v5071_v3, %v4118_v4  ;;  %v5009_v3 = vld [vmem:[#allocation5 + $0x414] sm:$0xf0]  ;;  %v4052_v4 = vld [vmem:[#allocation5 + $0x580] sm:$0xf] }
 0x117   : > { %2953 = vmatpush.bf16.msrb.mxu1 %v4409_v14  ;;  %v2714_v14 = vpop.f32.mrf.mxu2  ;;  %v4505_v32 = vor.u32 %v5167_v11, %v4502_v18  ;;  %v3644_v18 = vld [vmem:[#allocation5 + $0x250] sm:$0xf] }
 0x118   : > { %2966 = vmatpush.bf16.msrb.mxu2 %v4601_v15  ;;  %v4721_v15 = vor.u32 %v5221_v61, %v4718_v62  ;;  %v3668_v61 = vld [vmem:[#allocation5 + $0x280] sm:$0xf]  ;;  %v4077_v62 = vor.u32 %v5063_v55, %v4076_v54  ;;  %v3452_v14 = vld [vmem:[#allocation5 + $0xd0] sm:$0xf] }
 0x119   : > { %2979 = vmatpush.bf16.msrb.mxu3 %v4793_v23  ;;  %v2727_v23 = vpop.f32.mrf.mxu3 }
 0x11a   : > { %2941 = vmatpush.bf16.msrb.mxu0 %v4193_v29  ;;  %v3908_v29 = vld [vmem:[#allocation5 + $0x460] sm:$0xf]  ;;  %v3836_v23 = vld [vmem:[#allocation5 + $0x3d0] sm:$0xf] }
 0x11b   : > { %2954 = vmatpush.bf16.msrb.mxu1 %v4385_v30  ;;  %v5021_v30 = vld [vmem:[#allocation5 + $0x474] sm:$0xf0] }
 0x11c   : > { %2967 = vmatpush.bf16.msrb.mxu2 %v4577_v31  ;;  %v4313_v31 = vor.u32 %v5119_v8, %v4310_v10  ;;  %v3909_v45 = vor.u32 %v5021_v30, %v3908_v29  ;;  %v2726_v8 = vadd.f32 %v5731_v46, %v2713_v22  ;;  %v3669_v10 = vor.u32 %v4961_v0, %v3668_v61  ;;  %v3428_v30 = vld [vmem:[#allocation5 + $0xa0] sm:$0xf]  ;;  %v4943_v22 = vld [vmem:[#allocation5 + $0x204] sm:$0xf0] }
 0x11d   : > { %2980 = vmatpush.bf16.msrb.mxu3 %v4769_v41  ;;  %v4697_v41 = vor.u32 %v5215_v19, %v4694_v21  ;;  %v4955_v21 = vld [vmem:[#allocation5 + $0x264] sm:$0xf0] }
 0x11e   : > { %2942 = vmatpush.bf16.msrb.mxu0 %v4169_v49  ;;  %v3692_v49 = vld [vmem:[#allocation5 + $0x2b0] sm:$0xf]  ;;  %v3645_v46 = vor.u32 %v4955_v21, %v3644_v18  ;;  %v5033_v18 = vld [vmem:[#allocation5 + $0x4d4] sm:$0xf0] }
 0x11f   : > { %2955 = vmatpush.bf16.msrb.mxu1 %v4361_v51  ;;  %v4967_v51 = vld [vmem:[#allocation5 + $0x2c4] sm:$0xf0]  ;;  %v3356_v21 = vld [vmem:[#allocation5 + $0x10] sm:$0xf] }
 0x120   : > { %2968 = vmatpush.bf16.msrb.mxu2 %v4553_v52  ;;  %v3884_v52 = vld [vmem:[#allocation5 + $0x430] sm:$0xf] }
 0x121   : > { %2981 = vmatpush.bf16.msrb.mxu3 %v4745_v57  ;;  %v3693_v57 = vor.u32 %v4967_v51, %v3692_v49  ;;  %v3885_v58 = vor.u32 %v5015_v53, %v3884_v52  ;;  %v3404_v51 = vld [vmem:[#allocation5 + $0x70] sm:$0xf]  ;;  %v4895_v52 = vld [vmem:[#allocation5 + $0x84] sm:$0xf0] }
 0x122   : > { %2943 = vmatpush.bf16.msrb.mxu0 %v4145_v2  ;;  %v3860_v2 = vld [vmem:[#allocation5 + $0x400] sm:$0xf]  ;;  %v3596_v53 = vld [vmem:[#allocation5 + $0x1f0] sm:$0xf] }
 0x123   : > { %2956 = vmatpush.bf16.msrb.mxu1 %v4337_v5  ;;  %v5057_v5 = vld [vmem:[#allocation5 + $0x594] sm:$0xf0]  ;;  %v3861_v11 = vor.u32 %v5009_v3, %v3860_v2  ;;  %v3597_v2 = vor.u32 %v4943_v22, %v3596_v53  ;;  %v5111_v53 = vld [vmem:[#allocation5 + $0x744] sm:$0xf0]  ;;  %v4652_v22 = vld [vmem:[#allocation5 + $0xa30] sm:$0xf] }
 0x124   : > { %2969 = vmatpush.bf16.msrb.mxu2 %v4529_v6  ;;  %v3477_v6 = vor.u32 %v4913_v60, %v3476_v59  ;;  %v4053_v19 = vor.u32 %v5057_v5, %v4052_v4  ;;  %v3980_v59 = vld [vmem:[#allocation5 + $0x4f0] sm:$0xf]  ;;  %v3380_v4 = vld [vmem:[#allocation5 + $0x40] sm:$0xf]  ;;  %v4889_v5 = vld [vmem:[#allocation5 + $0x54] sm:$0xf0] }
 0x125   : > { %2982 = vmatpush.bf16.msrb.mxu3 %v4721_v15  ;;  %v4907_v15 = vld [vmem:[#allocation5 + $0xe4] sm:$0xf0] }
 0x126   : > { %2944 = vmatpush.bf16.msrb.mxu0 %v4121_v27  ;;  %v3453_v25 = vor.u32 %v4907_v15, %v3452_v14  ;;  %v2738_v26 = vpop.f32.mrf.mxu0  ;;  %v3837_v27 = vor.u32 %v5003_v7, %v3836_v23  ;;  %v3764_v14 = vld [vmem:[#allocation5 + $0x340] sm:$0xf]  ;;  %v4985_v15 = vld [vmem:[#allocation5 + $0x354] sm:$0xf0]  ;;  %v4883_v23 = vld [vmem:[#allocation5 + $0x24] sm:$0xf0] }
 0x127   : > { %2957 = vmatpush.bf16.msrb.mxu1 %v4313_v31  ;;  %v2739_v28 = vadd.f32 %v2738_v26, %v2726_v8  ;;  %v2751_v29 = vpop.f32.mrf.mxu1  ;;  %v4901_v31 = vld [vmem:[#allocation5 + $0xb4] sm:$0xf0]  ;;  %v3765_v24 = vor.u32 %v4985_v15, %v3764_v14 }
 0x128   : > { %2970 = vmatpush.bf16.msrb.mxu2 %v4505_v32  ;;  %v3620_v32 = vld [vmem:[#allocation5 + $0x220] sm:$0xf]  ;;  %v3429_v47 = vor.u32 %v4901_v31, %v3428_v30 }
 0x129   : > { %2983 = vmatpush.bf16.msrb.mxu3 %v4697_v41  ;;  %2945 = vmatmul.bf16.vlgmr.msrb.gmra.mxu0 %v5682_v37  ;;  %v3812_v41 = vld [vmem:[#allocation5 + $0x3a0] sm:$0xf]  ;;  %v2752_v44 = vadd.f32 %v2751_v29, %v2739_v28  ;;  %v3621_v48 = vor.u32 %v4949_v36, %v3620_v32  ;;  %v3932_v28 = vld [vmem:[#allocation5 + $0x490] sm:$0xf]  ;;  %v5027_v29 = vld [vmem:[#allocation5 + $0x4a4] sm:$0xf0]  ;;  %v3357_v36 = vor.u32 %v4883_v23, %v3356_v21 }
 0x12a   : > { %2989 = vmatpush.bf16.msra.mxu0 %v3525_v43  ;;  %2958 = vmatmul.bf16.vlgmr.msrb.gmra.mxu1 %v5686_v40  ;;  %v4997_v43 = vld [vmem:[#allocation5 + $0x3b4] sm:$0xf0]  ;;  %v4292_v31 = vld [vmem:[#allocation5 + $0x760] sm:$0xf] }
 0x12b   : > { %3002 = vmatpush.bf16.msra.mxu1 %v3717_v13  ;;  %2971 = vmatmul.bf16.vlgmr.msrb.gmra.mxu2 %v5680_v34  ;;  %v5045_v13 = vld [vmem:[#allocation5 + $0x534] sm:$0xf0]  ;;  %v3813_v49 = vor.u32 %v4997_v43, %v3812_v41  ;;  %v4676_v43 = vld [vmem:[#allocation5 + $0xa60] sm:$0xf] }
 0x12c   : > { %3015 = vmatpush.bf16.msra.mxu2 %v3909_v45  ;;  %2984 = vmatmul.bf16.vlgmr.msrb.gmra.mxu3 %v5684_v38  ;;  %v2661_v45 = vadd.f32 %v5717_v33, %v2648_v12  ;;  %v4005_v54 = vor.u32 %v5045_v13, %v4004_v20  ;;  %v5039_v33 = vld [vmem:[#allocation5 + $0x504] sm:$0xf0]  ;;  %v5117_v32 = vld [vmem:[#allocation5 + $0x774] sm:$0xf0] }
 0x12d   : > { %3028 = vmatpush.bf16.msra.mxu3 %v4101_v50  ;;  %v4931_v12 = vld [vmem:[#allocation5 + $0x1a4] sm:$0xf0]  ;;  %v5165_v41 = vld [vmem:[#allocation5 + $0x8f4] sm:$0xf0] }
 0x12e   : > { %2990 = vmatpush.bf16.msra.mxu0 %v3501_v56  ;;  %v2764_v50 = vpop.f32.mrf.mxu2  ;;  %v2674_v60 = vadd.f32 %v5719_v42, %v2661_v45  ;;  %v2740_v0 = vpop.f32.mrf.mxu0  ;;  %v3956_v42 = vld [vmem:[#allocation5 + $0x4c0] sm:$0xf]  ;;  %v3549_v20 = vor.u32 %v4931_v12, %v3548_v1  ;;  %v5195_v1 = vld [vmem:[#allocation5 + $0x9e4] sm:$0xf0]  ;;  %v4796_v12 = vld [vmem:[#allocation5 + $0xb50] sm:$0xf] }
 0x12f   : > { %3003 = vmatpush.bf16.msra.mxu1 %v3693_v57  ;;  %v2765_v55 = vadd.f32 %v2764_v50, %v2752_v44  ;;  %v2777_v56 = vpop.f32.mrf.mxu3  ;;  %v3788_v57 = vld [vmem:[#allocation5 + $0x370] sm:$0xf]  ;;  %v5213_v44 = vld [vmem:[#allocation5 + $0xa74] sm:$0xf0]  ;;  %v4868_v45 = vld [vmem:[#allocation5 + $0xbe0] sm:$0xf] }
 0x130   : > { %3016 = vmatpush.bf16.msra.mxu2 %v3885_v58  ;;  %v4991_v58 = vld [vmem:[#allocation5 + $0x384] sm:$0xf0]  ;;  %v5105_v0 = vld [vmem:[#allocation5 + $0x714] sm:$0xf0] }
 0x131   : > { %3029 = vmatpush.bf16.msra.mxu3 %v4077_v62  ;;  %v2778_v61 = vadd.f32 %v2777_v56, %v2765_v55  ;;  %v3405_v62 = vor.u32 %v4895_v52, %v3404_v51  ;;  %v3789_v3 = vor.u32 %v4991_v58, %v3788_v57  ;;  %v4677_v51 = vor.u32 %v5213_v44, %v4676_v43  ;;  %v4268_v52 = vld [vmem:[#allocation5 + $0x730] sm:$0xf]  ;;  %v5159_v56 = vld [vmem:[#allocation5 + $0x8c4] sm:$0xf0]  ;;  %v4580_v43 = vld [vmem:[#allocation5 + $0x9a0] sm:$0xf] }
 0x132   : > { %2991 = vmatpush.bf16.msra.mxu0 %v3477_v6  ;;  %v2753_v6 = vpop.f32.mrf.mxu1  ;;  %v5207_v57 = vld [vmem:[#allocation5 + $0xa44] sm:$0xf0]  ;;  %v4844_v58 = vld [vmem:[#allocation5 + $0xbb0] sm:$0xf]  ;;  %v5189_v44 = vld [vmem:[#allocation5 + $0x9b4] sm:$0xf0] }
 0x133   : > { %3004 = vmatpush.bf16.msra.mxu1 %v3669_v10  ;;  %v3197_v8 = vpack.c.bf16 %v2778_v61, %v2674_v60  ;;  %v3981_v10 = vor.u32 %v5039_v33, %v3980_v59  ;;  %v5255_v59 = vld [vmem:[#allocation5 + $0xbc4] sm:$0xf0]  ;;  %v4269_v33 = vor.u32 %v5111_v53, %v4268_v52  ;;  %v4653_v61 = vor.u32 %v5207_v57, %v4652_v22  ;;  %v4820_v6 = vld [vmem:[#allocation5 + $0xb80] sm:$0xf]  ;;  %v4364_v52 = vld [vmem:[#allocation5 + $0x7f0] sm:$0xf] }
 0x134   : > { %3017 = vmatpush.bf16.msra.mxu2 %v3861_v11  ;;  %v4937_v11 = vld [vmem:[#allocation5 + $0x1d4] sm:$0xf0]  ;;  %v5183_v22 = vld [vmem:[#allocation5 + $0x984] sm:$0xf0] }
 0x135   : > { %3030 = vmatpush.bf16.msra.mxu3 %v4053_v19  ;;  %3200 = vst [vmem:[%s5750_s23] sm:$0xff] %v3197_v8  ;;  %v3381_v19 = vor.u32 %v4889_v5, %v3380_v4  ;;  %v3573_v7 = vor.u32 %v4937_v11, %v3572_v39  ;;  %v5153_v4 = vld [vmem:[#allocation5 + $0x894] sm:$0xf0]  ;;  %v4628_v5 = vld [vmem:[#allocation5 + $0xa00] sm:$0xf]  ;;  %v4220_v11 = vld [vmem:[#allocation5 + $0x6d0] sm:$0xf] }
 0x136   : > { %2992 = vmatpush.bf16.msra.mxu0 %v3453_v25  ;;  %v3740_v25 = vld [vmem:[#allocation5 + $0x310] sm:$0xf]  ;;  %v2766_v26 = vpop.f32.mrf.mxu2  ;;  %v5201_v39 = vld [vmem:[#allocation5 + $0xa14] sm:$0xf0] }
 0x137   : > { %3005 = vmatpush.bf16.msra.mxu1 %v3645_v46  ;;  %v3957_v46 = vor.u32 %v5033_v18, %v3956_v42  ;;  %v2779_v30 = vpop.f32.mrf.mxu3  ;;  %v5249_v8 = vld [vmem:[#allocation5 + $0xb94] sm:$0xf0]  ;;  %v4629_v15 = vor.u32 %v5201_v39, %v4628_v5  ;;  %v5099_v42 = vld [vmem:[#allocation5 + $0x6e4] sm:$0xf0]  ;;  %v4412_v18 = vld [vmem:[#allocation5 + $0x850] sm:$0xf] }
 0x138   : > { %3018 = vmatpush.bf16.msra.mxu2 %v3837_v27  ;;  %v4979_v27 = vld [vmem:[#allocation5 + $0x324] sm:$0xf0]  ;;  %v4821_v23 = vor.u32 %v5249_v8, %v4820_v6  ;;  %v4221_v26 = vor.u32 %v5099_v42, %v4220_v11  ;;  %v5093_v30 = vld [vmem:[#allocation5 + $0x6b4] sm:$0xf0]  ;;  %v4340_v5 = vld [vmem:[#allocation5 + $0x7c0] sm:$0xf] }
 0x139   : > { %3031 = vmatpush.bf16.msra.mxu3 %v4029_v35  ;;  %v4484_v35 = vld [vmem:[#allocation5 + $0x8e0] sm:$0xf]  ;;  %v3741_v13 = vor.u32 %v4979_v27, %v3740_v25  ;;  %v5243_v25 = vld [vmem:[#allocation5 + $0xb64] sm:$0xf0]  ;;  %v5129_v8 = vld [vmem:[#allocation5 + $0x7d4] sm:$0xf0] }
 0x13a   : > { %2993 = vmatpush.bf16.msra.mxu0 %v3429_v47  ;;  %v5261_v47 = vld [vmem:[#allocation5 + $0xbf4] sm:$0xf0]  ;;  %v4485_v50 = vor.u32 %v5165_v41, %v4484_v35 }
 0x13b   : > { %3006 = vmatpush.bf16.msra.mxu1 %v3621_v48  ;;  %v3933_v48 = vor.u32 %v5027_v29, %v3932_v28  ;;  %v4869_v55 = vor.u32 %v5261_v47, %v4868_v45  ;;  %v4196_v29 = vld [vmem:[#allocation5 + $0x6a0] sm:$0xf]  ;;  %v5141_v41 = vld [vmem:[#allocation5 + $0x834] sm:$0xf0] }
 0x13c   : > { %3019 = vmatpush.bf16.msra.mxu2 %v3813_v49  ;;  %v4293_v49 = vor.u32 %v5117_v32, %v4292_v31  ;;  %v4388_v31 = vld [vmem:[#allocation5 + $0x820] sm:$0xf]  ;;  %v4197_v47 = vor.u32 %v5093_v30, %v4196_v29  ;;  %v5177_v11 = vld [vmem:[#allocation5 + $0x954] sm:$0xf0]  ;;  %v4922_v30 = vld [vmem:[#allocation5 + $0x164] sm:$0xf] }
 0x13d   : > { %3032 = vmatpush.bf16.msra.mxu3 %v4005_v54  ;;  %v4460_v54 = vld [vmem:[#allocation5 + $0x8b0] sm:$0xf] }
 0x13e   : > { %2994 = vmatpush.bf16.msra.mxu0 %v3405_v62  ;;  %v4461_v60 = vor.u32 %v5159_v56, %v4460_v54  ;;  %v4244_v62 = vld [vmem:[#allocation5 + $0x700] sm:$0xf]  ;;  %v4556_v56 = vld [vmem:[#allocation5 + $0x970] sm:$0xf] }
 0x13f   : > { %3007 = vmatpush.bf16.msra.mxu1 %v3597_v2  ;;  %v4436_v2 = vld [vmem:[#allocation5 + $0x880] sm:$0xf] }
 0x140   : > { %3020 = vmatpush.bf16.msra.mxu2 %v3789_v3  ;;  %v4845_v3 = vor.u32 %v5255_v59, %v4844_v58  ;;  %v4437_v14 = vor.u32 %v5153_v4, %v4436_v2  ;;  %v4748_v59 = vld [vmem:[#allocation5 + $0xaf0] sm:$0xf]  ;;  %v4557_v2 = vor.u32 %v5183_v22, %v4556_v56  ;;  %v5081_v4 = vld [vmem:[#allocation5 + $0x654] sm:$0xf0]  ;;  %v5012_v56 = vld [vmem:[#allocation5 + $0x434] sm:$0xf] }
 0x141   : > { %3033 = vmatpush.bf16.msra.mxu3 %v3981_v10  ;;  %v4245_v10 = vor.u32 %v5105_v0, %v4244_v62  ;;  %v3886_v22 = vld [vmem:[#allocation5 + $0x448] sm:$0xf0] }
 0x142   : > { %2995 = vmatpush.bf16.msra.mxu0 %v3381_v19  ;;  %v5757_v19 = vld [vmem:[#allocation7] sm:$0x3f] }
 0x143   : > { %3008 = vmatpush.bf16.msra.mxu1 %v3573_v7  ;;  %v643_v21 = vperm.slane %v5757_v19, 2  ;;  %v5147_v7 = vld [vmem:[#allocation5 + $0x864] sm:$0xf0] }
 0x144   : > { %3021 = vmatpush.bf16.msra.mxu2 %v3765_v24  ;;  %v4604_v24 = vld [vmem:[#allocation5 + $0x9d0] sm:$0xf]  ;;  %v4413_v27 = vor.u32 %v5147_v7, %v4412_v18 }
 0x145   : > { %3034 = vmatpush.bf16.msra.mxu3 %v3957_v46  ;;  %v4605_v28 = vor.u32 %v5195_v1, %v4604_v24  ;;  %v4124_v18 = vld [vmem:[#allocation5 + $0x610] sm:$0xf]  ;;  %v5123_v1 = vld [vmem:[#allocation5 + $0x7a4] sm:$0xf0] }
 0x146   : > { %2996 = vmatpush.bf16.msra.mxu0 %v3357_v36  ;;  %v2790_v46 = vpop.f32.mrf.mxu0  ;;  %v4797_v36 = vor.u32 %v5243_v25, %v4796_v12  ;;  %v4316_v24 = vld [vmem:[#allocation5 + $0x790] sm:$0xf] }
 0x147   : > { %3009 = vmatpush.bf16.msra.mxu1 %v3549_v20  ;;  %v2791_v32 = vadd.f32 %v2790_v46, %v643_v21  ;;  %v2803_v35 = vpop.f32.mrf.mxu1  ;;  %v4772_v20 = vld [vmem:[#allocation5 + $0xb20] sm:$0xf]  ;;  %v5075_v21 = vld [vmem:[#allocation5 + $0x624] sm:$0xf0]  ;;  %v4508_v12 = vld [vmem:[#allocation5 + $0x910] sm:$0xf] }
 0x148   : > { %3022 = vmatpush.bf16.msra.mxu2 %v3741_v13  ;;  %v5237_v13 = vld [vmem:[#allocation5 + $0xb34] sm:$0xf0]  ;;  %v5171_v46 = vld [vmem:[#allocation5 + $0x924] sm:$0xf0] }
 0x149   : > { %3035 = vmatpush.bf16.msra.mxu3 %v3933_v48  ;;  %2997 = vmatmul.bf16.vlgmr.msra.gmra.mxu0 %v5665_v9  ;;  %v2804_v45 = vadd.f32 %v2803_v35, %v2791_v32  ;;  %v4389_v48 = vor.u32 %v5141_v41, %v4388_v31  ;;  %v4773_v54 = vor.u32 %v5237_v13, %v4772_v20  ;;  %v3526_v31 = vld [vmem:[#allocation5 + $0x178] sm:$0xf0]  ;;  %v4970_v32 = vld [vmem:[#allocation5 + $0x2e4] sm:$0xf] }
 0x14a   : > { %3041 = vmatpush.bf16.msrb.mxu0 %v4293_v49  ;;  %3010 = vmatmul.bf16.vlgmr.msra.gmra.mxu1 %v5671_v17  ;;  %v4581_v49 = vor.u32 %v5189_v44, %v4580_v43  ;;  %v4125_v35 = vor.u32 %v5075_v21, %v4124_v18  ;;  %v5018_v41 = vld [vmem:[#allocation5 + $0x464] sm:$0xf]  ;;  %v3910_v43 = vld [vmem:[#allocation5 + $0x478] sm:$0xf0]  ;;  %v4317_v44 = vor.u32 %v5123_v1, %v4316_v24  ;;  %v4952_v18 = vld [vmem:[#allocation5 + $0x254] sm:$0xf] }
 0x14b   : > { %3054 = vmatpush.bf16.msrb.mxu1 %v4485_v50  ;;  %3023 = vmatmul.bf16.vlgmr.msra.gmra.mxu2 %v5661_v63  ;;  %v4172_v50 = vld [vmem:[#allocation5 + $0x670] sm:$0xf]  ;;  %v4509_v20 = vor.u32 %v5171_v46, %v4508_v12  ;;  %v5066_v13 = vld [vmem:[#allocation5 + $0x5e4] sm:$0xf]  ;;  %v3838_v24 = vld [vmem:[#allocation5 + $0x3e8] sm:$0xf0] }
 0x14c   : > { %3067 = vmatpush.bf16.msrb.mxu2 %v4677_v51  ;;  %3036 = vmatmul.bf16.vlgmr.msra.gmra.mxu3 %v5669_v16  ;;  %v5087_v51 = vld [vmem:[#allocation5 + $0x684] sm:$0xf0]  ;;  %v5048_v1 = vld [vmem:[#allocation5 + $0x554] sm:$0xf]  ;;  %v4030_v12 = vld [vmem:[#allocation5 + $0x568] sm:$0xf0] }
 0x14d   : > { %3080 = vmatpush.bf16.msrb.mxu3 %v4869_v55  ;;  %v5135_v55 = vld [vmem:[#allocation5 + $0x804] sm:$0xf0] }
 0x14e   : > { %3042 = vmatpush.bf16.msrb.mxu0 %v4269_v33  ;;  %v2816_v53 = vpop.f32.mrf.mxu2  ;;  %v5231_v33 = vld [vmem:[#allocation5 + $0xb04] sm:$0xf0]  ;;  %v2792_v62 = vpop.f32.mrf.mxu0  ;;  %v4365_v0 = vor.u32 %v5135_v55, %v4364_v52  ;;  %v3502_v52 = vld [vmem:[#allocation5 + $0x148] sm:$0xf0] }
 0x14f   : > { %3055 = vmatpush.bf16.msrb.mxu1 %v4461_v60  ;;  %v2817_v57 = vadd.f32 %v2816_v53, %v2804_v45  ;;  %v2829_v58 = vpop.f32.mrf.mxu3  ;;  %v4173_v60 = vor.u32 %v5087_v51, %v4172_v50  ;;  %v2805_v39 = vpop.f32.mrf.mxu1  ;;  %v4749_v6 = vor.u32 %v5231_v33, %v4748_v59  ;;  %v4102_v45 = vld [vmem:[#allocation5 + $0x5f8] sm:$0xf0]  ;;  %v3913_v50 = vor.u32 %v5018_v41, %v3910_v43  ;;  %v4916_v51 = vld [vmem:[#allocation5 + $0x134] sm:$0xf]  ;;  %v3694_v55 = vld [vmem:[#allocation5 + $0x2c8] sm:$0xf0] }
 0x150   : > { %3068 = vmatpush.bf16.msrb.mxu2 %v4653_v61  ;;  %v4964_v53 = vld [vmem:[#allocation5 + $0x2b4] sm:$0xf]  ;;  %v3505_v59 = vor.u32 %v4916_v51, %v3502_v52  ;;  %v4910_v62 = vld [vmem:[#allocation5 + $0x104] sm:$0xf]  ;;  %v3862_v39 = vld [vmem:[#allocation5 + $0x418] sm:$0xf0] }
 0x151   : > { %3081 = vmatpush.bf16.msrb.mxu3 %v4845_v3  ;;  %v5760_v61 = vadd.f32 %v2829_v58, %v2817_v57  ;;  %v4148_v3 = vld [vmem:[#allocation5 + $0x640] sm:$0xf]  ;;  %v5060_v57 = vld [vmem:[#allocation5 + $0x5b4] sm:$0xf]  ;;  %v4078_v58 = vld [vmem:[#allocation5 + $0x5c8] sm:$0xf0]  ;;  %v3697_v33 = vor.u32 %v4964_v53, %v3694_v55 }
 0x152   : > { %3043 = vmatpush.bf16.msrb.mxu0 %v4245_v10  ;;  %v4532_v10 = vld [vmem:[#allocation5 + $0x940] sm:$0xf]  ;;  %v4149_v42 = vor.u32 %v5081_v4, %v4148_v3  ;;  %v4081_v3 = vor.u32 %v5060_v57, %v4078_v58  ;;  %v3670_v4 = vld [vmem:[#allocation5 + $0x298] sm:$0xf0]  ;;  %v5042_v43 = vld [vmem:[#allocation5 + $0x524] sm:$0xf] }
 0x153   : > { %3056 = vmatpush.bf16.msrb.mxu1 %v4437_v14  ;;  %v4724_v14 = vld [vmem:[#allocation5 + $0xac0] sm:$0xf]  ;;  %v4533_v7 = vor.u32 %v5177_v11, %v4532_v10  ;;  %v3814_v41 = vld [vmem:[#allocation5 + $0x3b8] sm:$0xf0]  ;;  %v3598_v52 = vld [vmem:[#allocation5 + $0x208] sm:$0xf0] }
 0x154   : > { %3069 = vmatpush.bf16.msrb.mxu2 %v4629_v15  ;;  %v5225_v15 = vld [vmem:[#allocation5 + $0xad4] sm:$0xf0]  ;;  %v4988_v53 = vld [vmem:[#allocation5 + $0x374] sm:$0xf] }
 0x155   : > { %3082 = vmatpush.bf16.msrb.mxu3 %v4821_v23  ;;  %v4341_v23 = vor.u32 %v5129_v8, %v4340_v5  ;;  %v5006_v5 = vld [vmem:[#allocation5 + $0x404] sm:$0xf]  ;;  %v4054_v8 = vld [vmem:[#allocation5 + $0x598] sm:$0xf0] }
 0x156   : > { %3044 = vmatpush.bf16.msrb.mxu0 %v4221_v26  ;;  %v2818_v25 = vpop.f32.mrf.mxu2  ;;  %v4725_v26 = vor.u32 %v5225_v15, %v4724_v14  ;;  %v3865_v14 = vor.u32 %v5006_v5, %v3862_v39  ;;  %v4904_v15 = vld [vmem:[#allocation5 + $0xd4] sm:$0xf]  ;;  %v4982_v5 = vld [vmem:[#allocation5 + $0x344] sm:$0xf]  ;;  %v3766_v39 = vld [vmem:[#allocation5 + $0x358] sm:$0xf0] }
 0x157   : > { %3057 = vmatpush.bf16.msrb.mxu1 %v4413_v27  ;;  %v4700_v27 = vld [vmem:[#allocation5 + $0xa90] sm:$0xf]  ;;  %v2831_v29 = vpop.f32.mrf.mxu3 }
 0x158   : > { %3070 = vmatpush.bf16.msrb.mxu2 %v4605_v28  ;;  %v5219_v28 = vld [vmem:[#allocation5 + $0xaa4] sm:$0xf0]  ;;  %v3430_v29 = vld [vmem:[#allocation5 + $0xb8] sm:$0xf0] }
 0x159   : > { %3083 = vmatpush.bf16.msrb.mxu3 %v4797_v36  ;;  %v3718_v36 = vld [vmem:[#allocation5 + $0x2f8] sm:$0xf0] }
 0x15a   : > { %3045 = vmatpush.bf16.msrb.mxu0 %v4197_v47  ;;  %v4701_v47 = vor.u32 %v5219_v28, %v4700_v27  ;;  %v4898_v28 = vld [vmem:[#allocation5 + $0xa4] sm:$0xf] }
 0x15b   : > { %3058 = vmatpush.bf16.msrb.mxu1 %v4389_v48  ;;  %v3529_v48 = vor.u32 %v4922_v30, %v3526_v31  ;;  %v4946_v30 = vld [vmem:[#allocation5 + $0x224] sm:$0xf] }
 0x15c   : > { %3071 = vmatpush.bf16.msrb.mxu2 %v4581_v49  ;;  %v3721_v49 = vor.u32 %v4970_v32, %v3718_v36  ;;  %v4033_v32 = vor.u32 %v5048_v1, %v4030_v12  ;;  %v4994_v36 = vld [vmem:[#allocation5 + $0x3a4] sm:$0xf]  ;;  %v3742_v1 = vld [vmem:[#allocation5 + $0x328] sm:$0xf0]  ;;  %v5024_v12 = vld [vmem:[#allocation5 + $0x494] sm:$0xf] }
 0x15d   : > { %3084 = vmatpush.bf16.msrb.mxu3 %v4773_v54  ;;  %v4105_v54 = vor.u32 %v5066_v13, %v4102_v45  ;;  %v3817_v45 = vor.u32 %v4994_v36, %v3814_v41  ;;  %v4678_v36 = vld [vmem:[#allocation5 + $0xa78] sm:$0xf0] }
 0x15e   : > { %3046 = vmatpush.bf16.msrb.mxu0 %v4173_v60  ;;  %v3889_v60 = vor.u32 %v5012_v56, %v3886_v22  ;;  %v5036_v56 = vld [vmem:[#allocation5 + $0x4f4] sm:$0xf]  ;;  %v3982_v22 = vld [vmem:[#allocation5 + $0x508] sm:$0xf0] }
 0x15f   : > { %3059 = vmatpush.bf16.msrb.mxu1 %v4365_v0  ;;  %v3478_v0 = vld [vmem:[#allocation5 + $0x118] sm:$0xf0] }
 0x160   : > { %3072 = vmatpush.bf16.msrb.mxu2 %v4557_v2  ;;  %v4958_v2 = vld [vmem:[#allocation5 + $0x284] sm:$0xf]  ;;  %v3481_v10 = vor.u32 %v4910_v62, %v3478_v0  ;;  %v3382_v62 = vld [vmem:[#allocation5 + $0x58] sm:$0xf0] }
 0x161   : > { %3085 = vmatpush.bf16.msrb.mxu3 %v4749_v6  ;;  %v5054_v6 = vld [vmem:[#allocation5 + $0x584] sm:$0xf]  ;;  %v3673_v11 = vor.u32 %v4958_v2, %v3670_v4  ;;  %v3574_v4 = vld [vmem:[#allocation5 + $0x1d8] sm:$0xf0] }
 0x162   : > { %3047 = vmatpush.bf16.msrb.mxu0 %v4149_v42  ;;  %v3454_v42 = vld [vmem:[#allocation5 + $0xe8] sm:$0xf0]  ;;  %v4057_v21 = vor.u32 %v5054_v6, %v4054_v8  ;;  %v4934_v0 = vld [vmem:[#allocation5 + $0x1c4] sm:$0xf]  ;;  %v3958_v8 = vld [vmem:[#allocation5 + $0x4d8] sm:$0xf0] }
 0x163   : > { %3060 = vmatpush.bf16.msrb.mxu1 %v4341_v23  ;;  %v3646_v23 = vld [vmem:[#allocation5 + $0x268] sm:$0xf0]  ;;  %v3457_v25 = vor.u32 %v4904_v15, %v3454_v42  ;;  %v5030_v6 = vld [vmem:[#allocation5 + $0x4c4] sm:$0xf]  ;;  %v3577_v15 = vor.u32 %v4934_v0, %v3574_v4  ;;  %v3769_v42 = vor.u32 %v4982_v5, %v3766_v39  ;;  %v4246_v0 = vld [vmem:[#allocation5 + $0x718] sm:$0xf0] }
 0x164   : > { %3073 = vmatpush.bf16.msrb.mxu2 %v4533_v7  ;;  %v5000_v7 = vld [vmem:[#allocation5 + $0x3d4] sm:$0xf]  ;;  %v3649_v46 = vor.u32 %v4952_v18, %v3646_v23  ;;  %v4438_v4 = vld [vmem:[#allocation5 + $0x898] sm:$0xf0]  ;;  %v5198_v5 = vld [vmem:[#allocation5 + $0xa04] sm:$0xf] }
 0x165   : > { %3086 = vmatpush.bf16.msrb.mxu3 %v4725_v26  ;;  %v3841_v27 = vor.u32 %v5000_v7, %v3838_v24  ;;  %v4928_v18 = vld [vmem:[#allocation5 + $0x194] sm:$0xf]  ;;  %v3961_v24 = vor.u32 %v5030_v6, %v3958_v8  ;;  %v4630_v39 = vld [vmem:[#allocation5 + $0xa18] sm:$0xf0]  ;;  %v5246_v6 = vld [vmem:[#allocation5 + $0xb84] sm:$0xf] }
 0x166   : > { %3048 = vmatpush.bf16.msrb.mxu0 %v4125_v35  ;;  %v5766_v26 = vpop.f32.mrf.mxu0  ;;  %v3622_v35 = vld [vmem:[#allocation5 + $0x238] sm:$0xf0]  ;;  %v4976_v23 = vld [vmem:[#allocation5 + $0x314] sm:$0xf] }
 0x167   : > { %3061 = vmatpush.bf16.msrb.mxu1 %v4317_v44  ;;  %v5768_v31 = vpop.f32.mrf.mxu1  ;;  %v4006_v44 = vld [vmem:[#allocation5 + $0x538] sm:$0xf0]  ;;  %v3625_v13 = vor.u32 %v4946_v30, %v3622_v35  ;;  %v5210_v35 = vld [vmem:[#allocation5 + $0xa64] sm:$0xf] }
 0x168   : > { %3074 = vmatpush.bf16.msrb.mxu2 %v4509_v20  ;;  %v3433_v20 = vor.u32 %v4898_v28, %v3430_v29  ;;  %v4009_v51 = vor.u32 %v5042_v43, %v4006_v44  ;;  %v4294_v28 = vld [vmem:[#allocation5 + $0x778] sm:$0xf0]  ;;  %v5162_v29 = vld [vmem:[#allocation5 + $0x8e4] sm:$0xf]  ;;  %v3745_v43 = vor.u32 %v4976_v23, %v3742_v1  ;;  %v5192_v23 = vld [vmem:[#allocation5 + $0x9d4] sm:$0xf] }
 0x169   : > { %3087 = vmatpush.bf16.msrb.mxu3 %v4701_v47  ;;  %3049 = vmatmul.bf16.vlgmr.msrb.gmra.mxu0 %v5682_v37  ;;  %v4892_v47 = vld [vmem:[#allocation5 + $0x74] sm:$0xf]  ;;  %v5258_v44 = vld [vmem:[#allocation5 + $0xbe4] sm:$0xf]  ;;  %v4822_v8 = vld [vmem:[#allocation5 + $0xb98] sm:$0xf0] }
 0x16a   : > { %3093 = vmatpush.bf16.msra.mxu0 %v3529_v48  ;;  %3062 = vmatmul.bf16.vlgmr.msrb.gmra.mxu1 %v5686_v40  ;;  %v3406_v48 = vld [vmem:[#allocation5 + $0x88] sm:$0xf0] }
 0x16b   : > { %3106 = vmatpush.bf16.msra.mxu1 %v3721_v49  ;;  %3075 = vmatmul.bf16.vlgmr.msrb.gmra.mxu2 %v5680_v34  ;;  %v4940_v49 = vld [vmem:[#allocation5 + $0x1f4] sm:$0xf]  ;;  %v3409_v57 = vor.u32 %v4892_v47, %v3406_v48  ;;  %v4681_v48 = vor.u32 %v5210_v35, %v4678_v36  ;;  %v4582_v35 = vld [vmem:[#allocation5 + $0x9b8] sm:$0xf0]  ;;  %v5234_v36 = vld [vmem:[#allocation5 + $0xb24] sm:$0xf] }
 0x16c   : > { %3119 = vmatpush.bf16.msra.mxu2 %v3913_v50  ;;  %3088 = vmatmul.bf16.vlgmr.msrb.gmra.mxu3 %v5684_v38 }
 0x16d   : > { %3132 = vmatpush.bf16.msra.mxu3 %v4105_v54  ;;  %v3790_v54 = vld [vmem:[#allocation5 + $0x388] sm:$0xf0] }
 0x16e   : > { %3094 = vmatpush.bf16.msra.mxu0 %v3505_v59  ;;  %v5770_v50 = vpop.f32.mrf.mxu2  ;;  %v2844_v58 = vpop.f32.mrf.mxu0  ;;  %v3601_v59 = vor.u32 %v4940_v49, %v3598_v52  ;;  %v5108_v49 = vld [vmem:[#allocation5 + $0x734] sm:$0xf] }
 0x16f   : > { %3107 = vmatpush.bf16.msra.mxu1 %v3697_v33  ;;  %v5772_v55 = vpop.f32.mrf.mxu3  ;;  %v3793_v33 = vor.u32 %v4988_v53, %v3790_v54  ;;  %v2857_v2 = vpop.f32.mrf.mxu1  ;;  %v5156_v52 = vld [vmem:[#allocation5 + $0x8b4] sm:$0xf]  ;;  %v4462_v54 = vld [vmem:[#allocation5 + $0x8c8] sm:$0xf0] }
 0x170   : > { %3120 = vmatpush.bf16.msra.mxu2 %v3889_v60  ;;  %v4886_v60 = vld [vmem:[#allocation5 + $0x44] sm:$0xf]  ;;  %v4846_v58 = vld [vmem:[#allocation5 + $0xbc8] sm:$0xf0] }
 0x171   : > { %3133 = vmatpush.bf16.msra.mxu3 %v4081_v3  ;;  %v3985_v3 = vor.u32 %v5036_v56, %v3982_v22  ;;  %v5204_v56 = vld [vmem:[#allocation5 + $0xa34] sm:$0xf]  ;;  %v4654_v22 = vld [vmem:[#allocation5 + $0xa48] sm:$0xf0]  ;;  %v5150_v2 = vld [vmem:[#allocation5 + $0x884] sm:$0xf] }
 0x172   : > { %3095 = vmatpush.bf16.msra.mxu0 %v3481_v10  ;;  %v3385_v10 = vor.u32 %v4886_v60, %v3382_v62  ;;  %v4657_v60 = vor.u32 %v5204_v56, %v4654_v22  ;;  %v5102_v62 = vld [vmem:[#allocation5 + $0x704] sm:$0xf]  ;;  %v5228_v56 = vld [vmem:[#allocation5 + $0xaf4] sm:$0xf]  ;;  %v4750_v22 = vld [vmem:[#allocation5 + $0xb08] sm:$0xf0] }
 0x173   : > { %3108 = vmatpush.bf16.msra.mxu1 %v3673_v11  ;;  %v4880_v11 = vld [vmem:[#allocation5 + $0x14] sm:$0xf] }
 0x174   : > { %3121 = vmatpush.bf16.msra.mxu2 %v3865_v14  ;;  %v3358_v14 = vld [vmem:[#allocation5 + $0x28] sm:$0xf0] }
 0x175   : > { %3134 = vmatpush.bf16.msra.mxu3 %v4057_v21  ;;  %v3550_v21 = vld [vmem:[#allocation5 + $0x1a8] sm:$0xf0]  ;;  %v3361_v30 = vor.u32 %v4880_v11, %v3358_v14  ;;  %v4441_v11 = vor.u32 %v5150_v2, %v4438_v4  ;;  %v4633_v14 = vor.u32 %v5198_v5, %v4630_v39  ;;  %v4342_v4 = vld [vmem:[#allocation5 + $0x7d8] sm:$0xf0]  ;;  %v5174_v5 = vld [vmem:[#allocation5 + $0x944] sm:$0xf] }
 0x176   : > { %3096 = vmatpush.bf16.msra.mxu0 %v3457_v25  ;;  %v2870_v7 = vpop.f32.mrf.mxu2  ;;  %v3934_v25 = vld [vmem:[#allocation5 + $0x4a8] sm:$0xf0]  ;;  %v3553_v41 = vor.u32 %v4928_v18, %v3550_v21  ;;  %v4825_v18 = vor.u32 %v5246_v6, %v4822_v8  ;;  %v4534_v39 = vld [vmem:[#allocation5 + $0x958] sm:$0xf0]  ;;  %v5222_v6 = vld [vmem:[#allocation5 + $0xac4] sm:$0xf] }
 0x177   : > { %3109 = vmatpush.bf16.msra.mxu1 %v3649_v46  ;;  %v2883_v46 = vpop.f32.mrf.mxu3  ;;  %v4414_v21 = vld [vmem:[#allocation5 + $0x868] sm:$0xf0]  ;;  %v5240_v7 = vld [vmem:[#allocation5 + $0xb54] sm:$0xf]  ;;  %v4726_v8 = vld [vmem:[#allocation5 + $0xad8] sm:$0xf0] }
 0x178   : > { %3122 = vmatpush.bf16.msra.mxu2 %v3841_v27  ;;  %v5114_v27 = vld [vmem:[#allocation5 + $0x764] sm:$0xf]  ;;  %v4198_v46 = vld [vmem:[#allocation5 + $0x6b8] sm:$0xf0] }
 0x179   : > { %3135 = vmatpush.bf16.msra.mxu3 %v4033_v32  ;;  %v4486_v32 = vld [vmem:[#allocation5 + $0x8f8] sm:$0xf0] }
 0x17a   : > { %3097 = vmatpush.bf16.msra.mxu0 %v3433_v20  ;;  %v4870_v20 = vld [vmem:[#allocation5 + $0xbf8] sm:$0xf0]  ;;  %v4489_v47 = vor.u32 %v5162_v29, %v4486_v32  ;;  %v5186_v32 = vld [vmem:[#allocation5 + $0x9a4] sm:$0xf] }
 0x17b   : > { %3110 = vmatpush.bf16.msra.mxu1 %v3625_v13  ;;  %v3937_v13 = vor.u32 %v5024_v12, %v3934_v25  ;;  %v4873_v53 = vor.u32 %v5258_v44, %v4870_v20  ;;  %v5090_v25 = vld [vmem:[#allocation5 + $0x6a4] sm:$0xf]  ;;  %v4585_v20 = vor.u32 %v5186_v32, %v4582_v35 }
 0x17c   : > { %3123 = vmatpush.bf16.msra.mxu2 %v3817_v45  ;;  %v4297_v45 = vor.u32 %v5114_v27, %v4294_v28  ;;  %v5138_v27 = vld [vmem:[#allocation5 + $0x824] sm:$0xf] }
 0x17d   : > { %3136 = vmatpush.bf16.msra.mxu3 %v4009_v51  ;;  %v4270_v51 = vld [vmem:[#allocation5 + $0x748] sm:$0xf0] }
 0x17e   : > { %3098 = vmatpush.bf16.msra.mxu0 %v3409_v57  ;;  %v5252_v57 = vld [vmem:[#allocation5 + $0xbb4] sm:$0xf] }
 0x17f   : > { %3111 = vmatpush.bf16.msra.mxu1 %v3601_v59  ;;  %v4273_v59 = vor.u32 %v5108_v49, %v4270_v51  ;;  %v4366_v51 = vld [vmem:[#allocation5 + $0x808] sm:$0xf0] }
 0x180   : > { %3124 = vmatpush.bf16.msra.mxu2 %v3793_v33  ;;  %v4465_v33 = vor.u32 %v5156_v52, %v4462_v54  ;;  %v5180_v52 = vld [vmem:[#allocation5 + $0x974] sm:$0xf] }
 0x181   : > { %3137 = vmatpush.bf16.msra.mxu3 %v3985_v3  ;;  %v4849_v3 = vor.u32 %v5252_v57, %v4846_v58 }
 0x182   : > { %3099 = vmatpush.bf16.msra.mxu0 %v3385_v10  ;;  %v4249_v10 = vor.u32 %v5102_v62, %v4246_v0  ;;  %v4150_v62 = vld [vmem:[#allocation5 + $0x658] sm:$0xf0]  ;;  %v5126_v0 = vld [vmem:[#allocation5 + $0x7c4] sm:$0xf] }
 0x183   : > { %3112 = vmatpush.bf16.msra.mxu1 %v3577_v15  ;;  %v5096_v15 = vld [vmem:[#allocation5 + $0x6d4] sm:$0xf] }
 0x184   : > { %3125 = vmatpush.bf16.msra.mxu2 %v3769_v42  ;;  %v4222_v42 = vld [vmem:[#allocation5 + $0x6e8] sm:$0xf0] }
 0x185   : > { %3138 = vmatpush.bf16.msra.mxu3 %v3961_v24  ;;  %v4798_v24 = vld [vmem:[#allocation5 + $0xb68] sm:$0xf0] }
 0x186   : > { %3100 = vmatpush.bf16.msra.mxu0 %v3361_v30  ;;  %v5778_v1 = vpop.f32.mrf.mxu0  ;;  %v4801_v29 = vor.u32 %v5240_v7, %v4798_v24  ;;  %v4390_v30 = vld [vmem:[#allocation5 + $0x838] sm:$0xf0]  ;;  %v5168_v7 = vld [vmem:[#allocation5 + $0x914] sm:$0xf]  ;;  %v4510_v24 = vld [vmem:[#allocation5 + $0x928] sm:$0xf0] }
 0x187   : > { %3113 = vmatpush.bf16.msra.mxu1 %v3553_v41  ;;  %v5780_v28 = vpop.f32.mrf.mxu1  ;;  %v4774_v41 = vld [vmem:[#allocation5 + $0xb38] sm:$0xf0]  ;;  %v4393_v44 = vor.u32 %v5138_v27, %v4390_v30 }
 0x188   : > { %3126 = vmatpush.bf16.msra.mxu2 %v3745_v43  ;;  %v4201_v43 = vor.u32 %v5090_v25, %v4198_v46  ;;  %v4777_v49 = vor.u32 %v5234_v36, %v4774_v41  ;;  %v4702_v25 = vld [vmem:[#allocation5 + $0xaa8] sm:$0xf0] }
 0x189   : > { %3139 = vmatpush.bf16.msra.mxu3 %v3937_v13  ;;  %3101 = vmatmul.bf16.vlgmr.msra.gmra.mxu0 %v5665_v9  ;;  %v4225_v9 = vor.u32 %v5096_v15, %v4222_v42  ;;  %v5084_v13 = vld [vmem:[#allocation5 + $0x674] sm:$0xf]  ;;  %v4537_v15 = vor.u32 %v5174_v5, %v4534_v39 }
 0x18a   : > { %3145 = vmatpush.bf16.msrb.mxu0 %v4297_v45  ;;  %3114 = vmatmul.bf16.vlgmr.msra.gmra.mxu1 %v5671_v17  ;;  %v4174_v45 = vld [vmem:[#allocation5 + $0x688] sm:$0xf0]  ;;  %v5072_v42 = vld [vmem:[#allocation5 + $0x614] sm:$0xf] }
 0x18b   : > { %3158 = vmatpush.bf16.msrb.mxu1 %v4489_v47  ;;  %3127 = vmatmul.bf16.vlgmr.msra.gmra.mxu2 %v5661_v63  ;;  %v5144_v63 = vld [vmem:[#allocation5 + $0x854] sm:$0xf]  ;;  %v4177_v57 = vor.u32 %v5084_v13, %v4174_v45 }
 0x18c   : > { %3171 = vmatpush.bf16.msrb.mxu2 %v4681_v48  ;;  %3140 = vmatmul.bf16.vlgmr.msra.gmra.mxu3 %v5669_v16  ;;  %v4606_v16 = vld [vmem:[#allocation5 + $0x9e8] sm:$0xf0]  ;;  %v4417_v17 = vor.u32 %v5144_v63, %v4414_v21  ;;  %v5132_v47 = vld [vmem:[#allocation5 + $0x7f4] sm:$0xf] }
 0x18d   : > { %3184 = vmatpush.bf16.msrb.mxu3 %v4873_v53  ;;  %v4609_v12 = vor.u32 %v5192_v23, %v4606_v16  ;;  %v4558_v53 = vld [vmem:[#allocation5 + $0x988] sm:$0xf0]  ;;  %v4729_v23 = vor.u32 %v5222_v6, %v4726_v8 }
 0x18e   : > { %3146 = vmatpush.bf16.msrb.mxu0 %v4273_v59  ;;  %v2920_v48 = vpop.f32.mrf.mxu2  ;;  %v2896_v58 = vpop.f32.mrf.mxu0  ;;  %v4369_v59 = vor.u32 %v5132_v47, %v4366_v51  ;;  %v4126_v63 = vld [vmem:[#allocation5 + $0x628] sm:$0xf0] }
 0x18f   : > { %3159 = vmatpush.bf16.msrb.mxu1 %v4465_v33  ;;  %v2933_v54 = vpop.f32.mrf.mxu3  ;;  %v4561_v33 = vor.u32 %v5180_v52, %v4558_v53  ;;  %v2909_v2 = vpop.f32.mrf.mxu1  ;;  %v4318_v16 = vld [vmem:[#allocation5 + $0x7a8] sm:$0xf0]  ;;  %v4129_v46 = vor.u32 %v5072_v42, %v4126_v63  ;;  %v646_v42 = vperm.slane %v5757_v19, 5 }
 0x190   : > { %3172 = vmatpush.bf16.msrb.mxu2 %v4657_v60  ;;  %v5078_v60 = vld [vmem:[#allocation5 + $0x644] sm:$0xf] }
 0x191   : > { %3185 = vmatpush.bf16.msrb.mxu3 %v4849_v3  ;;  %v4753_v3 = vor.u32 %v5228_v56, %v4750_v22 }
 0x192   : > { %3147 = vmatpush.bf16.msrb.mxu0 %v4249_v10  ;;  %v644_v10 = vperm.slane %v5757_v19, 3 }
 0x193   : > { %3160 = vmatpush.bf16.msrb.mxu1 %v4441_v11  ;;  %v4153_v11 = vor.u32 %v5078_v60, %v4150_v62 }
 0x194   : > { %3173 = vmatpush.bf16.msrb.mxu2 %v4633_v14  ;;  %v4345_v14 = vor.u32 %v5126_v0, %v4342_v4 }
 0x195   : > { %3186 = vmatpush.bf16.msrb.mxu3 %v4825_v18  ;;  %v5120_v18 = vld [vmem:[#allocation5 + $0x794] sm:$0xf] }
 0x196   : > { %3148 = vmatpush.bf16.msrb.mxu0 %v4225_v9  ;;  %v2922_v21 = vpop.f32.mrf.mxu2  ;;  %v4321_v27 = vor.u32 %v5120_v18, %v4318_v16 }
 0x197   : > { %3161 = vmatpush.bf16.msrb.mxu1 %v4417_v17  ;;  %v2935_v9 = vpop.f32.mrf.mxu3  ;;  %v2895_v17 = vadd.f32 %v5778_v1, %v644_v10  ;;  %v2843_v1 = vadd.f32 %v5766_v26, %v5760_v61 }
 0x198   : > { %3174 = vmatpush.bf16.msrb.mxu2 %v4609_v12  ;;  %v5216_v12 = vld [vmem:[#allocation5 + $0xa94] sm:$0xf] }
 0x199   : > { %3187 = vmatpush.bf16.msrb.mxu3 %v4801_v29  ;;  %v4513_v29 = vor.u32 %v5168_v7, %v4510_v24  ;;  %v4705_v30 = vor.u32 %v5216_v12, %v4702_v25  ;;  %v2908_v32 = vadd.f32 %v5780_v28, %v2895_v17  ;;  %v2856_v28 = vadd.f32 %v5768_v31, %v2843_v1 }
 0x19a   : > { %3149 = vmatpush.bf16.msrb.mxu0 %v4201_v43  ;;  %v645_v31 = vperm.slane %v5757_v19, 4 }
 0x19b   : > { %3162 = vmatpush.bf16.msrb.mxu1 %v4393_v44  ;;  %v2921_v35 = vadd.f32 %v2920_v48, %v2908_v32  ;;  %v2869_v13 = vadd.f32 %v5770_v50, %v2856_v28 }
 0x19c   : > { %3175 = vmatpush.bf16.msrb.mxu2 %v4585_v20 }
 0x19d   : > { %3188 = vmatpush.bf16.msrb.mxu3 %v4777_v49  ;;  %v2934_v36 = vadd.f32 %v2933_v54, %v2921_v35 }
 0x19e   : > { %3150 = vmatpush.bf16.msrb.mxu0 %v4177_v57 }
 0x19f   : > { %3163 = vmatpush.bf16.msrb.mxu1 %v4369_v59 }
 0x1a0   : > { %3176 = vmatpush.bf16.msrb.mxu2 %v4561_v33 }
 0x1a1   : > { %3189 = vmatpush.bf16.msrb.mxu3 %v4753_v3 }
 0x1a2   : > { %3151 = vmatpush.bf16.msrb.mxu0 %v4153_v11 }
 0x1a3   : > { %3164 = vmatpush.bf16.msrb.mxu1 %v4345_v14 }
 0x1a4   : > { %3177 = vmatpush.bf16.msrb.mxu2 %v4537_v15 }
 0x1a5   : > { %3190 = vmatpush.bf16.msrb.mxu3 %v4729_v23 }
 0x1a6   : > { %3152 = vmatpush.bf16.msrb.mxu0 %v4129_v46  ;;  %v2946_v41 = vpop.f32.mrf.mxu0 }
 0x1a7   : > { %3165 = vmatpush.bf16.msrb.mxu1 %v4321_v27  ;;  %v2947_v43 = vadd.f32 %v2946_v41, %v2934_v36  ;;  %v2959_v44 = vpop.f32.mrf.mxu1 }
 0x1a8   : > { %3178 = vmatpush.bf16.msrb.mxu2 %v4513_v29 }
 0x1a9   : > { %3191 = vmatpush.bf16.msrb.mxu3 %v4705_v30  ;;  %3153 = vmatmul.bf16.vlgmr.msrb.gmra.mxu0 %v5682_v37  ;;  %v2960_v20 = vadd.f32 %v2959_v44, %v2947_v43 }
 0x1aa   : > { %3166 = vmatmul.bf16.vlgmr.msrb.gmra.mxu1 %v5686_v40 }
 0x1ab   : > { %3179 = vmatmul.bf16.vlgmr.msrb.gmra.mxu2 %v5680_v34  ;;  %v2882_v34 = vadd.f32 %v5772_v55, %v2869_v13 }
 0x1ac   : > { %3192 = vmatmul.bf16.vlgmr.msrb.gmra.mxu3 %v5684_v38 }
 0x1ae   : > { %v2972_v37 = vpop.f32.mrf.mxu2  ;;  %v2948_v38 = vpop.f32.mrf.mxu0 }
 0x1af   : > { %v2973_v45 = vadd.f32 %v2972_v37, %v2960_v20  ;;  %v2985_v40 = vpop.f32.mrf.mxu3  ;;  %v2961_v48 = vpop.f32.mrf.mxu1 }
 0x1b1   : > { %v2986_v47 = vadd.f32 %v2985_v40, %v2973_v45 }
 0x1b3   : > { %v3198_v49 = vpack.c.bf16 %v2986_v47, %v2882_v34 }
 0x1b5   : > { %3201 = vst [vmem:[%s5750_s23 + $0x8] sm:$0xff] %v3198_v49 }
 0x1b6   : > { %v2974_v61 = vpop.f32.mrf.mxu2 }
 0x1b7   : > { %v2987_v26 = vpop.f32.mrf.mxu3 }
 0x1c6   : > { %v2998_v51 = vpop.f32.mrf.mxu0 }
 0x1c7   : > { %v2999_v52 = vadd.f32 %v2998_v51, %v645_v31  ;;  %v3011_v53 = vpop.f32.mrf.mxu1 }
 0x1c9   : > { %v3012_v54 = vadd.f32 %v3011_v53, %v2999_v52 }
 0x1ce   : > { %v3024_v56 = vpop.f32.mrf.mxu2  ;;  %v3000_v58 = vpop.f32.mrf.mxu0 }
 0x1cf   : > { %v3025_v50 = vadd.f32 %v3024_v56, %v3012_v54  ;;  %v3037_v22 = vpop.f32.mrf.mxu3  ;;  %v3013_v59 = vpop.f32.mrf.mxu1 }
 0x1d1   : > { %v3038_v57 = vadd.f32 %v3037_v22, %v3025_v50 }
 0x1d6   : > { %v3026_v55 = vpop.f32.mrf.mxu2 }
 0x1d7   : > { %v3039_v33 = vpop.f32.mrf.mxu3 }
 0x1e6   : > { %v3050_v60 = vpop.f32.mrf.mxu0 }
 0x1e7   : > { %v3063_v62 = vpop.f32.mrf.mxu1  ;;  %v3051_v7 = vadd.f32 %v3050_v60, %v3038_v57 }
 0x1e9   : > { %v3064_v12 = vadd.f32 %v3063_v62, %v3051_v7 }
 0x1ee   : > { %v3076_v0 = vpop.f32.mrf.mxu2  ;;  %v3052_v3 = vpop.f32.mrf.mxu0 }
 0x1ef   : > { %v3089_v2 = vpop.f32.mrf.mxu3  ;;  %v3065_v4 = vpop.f32.mrf.mxu1  ;;  %v3077_v46 = vadd.f32 %v3076_v0, %v3064_v12 }
 0x1f1   : > { %v3090_v1 = vadd.f32 %v3089_v2, %v3077_v46 }
 0x1f6   : > { %v3078_v5 = vpop.f32.mrf.mxu2 }
 0x1f7   : > { %v3091_v39 = vpop.f32.mrf.mxu3 }
 0x206   : > { %v3102_v6 = vpop.f32.mrf.mxu0 }
 0x207   : > { %v3115_v8 = vpop.f32.mrf.mxu1  ;;  %v3103_v21 = vadd.f32 %v3102_v6, %v646_v42 }
 0x209   : > { %v3116_v23 = vadd.f32 %v3115_v8, %v3103_v21 }
 0x20e   : > { %v3128_v10 = vpop.f32.mrf.mxu2  ;;  %v3104_v14 = vpop.f32.mrf.mxu0 }
 0x20f   : > { %v3141_v11 = vpop.f32.mrf.mxu3  ;;  %v3117_v15 = vpop.f32.mrf.mxu1  ;;  %v3129_v16 = vadd.f32 %v3128_v10, %v3116_v23 }
 0x211   : > { %v3142_v24 = vadd.f32 %v3141_v11, %v3129_v16 }
 0x216   : > { %v3130_v63 = vpop.f32.mrf.mxu2 }
 0x217   : > { %v3143_v18 = vpop.f32.mrf.mxu3 }
 0x226   : > { %v3154_v9 = vpop.f32.mrf.mxu0 }
 0x227   : > { %v3167_v17 = vpop.f32.mrf.mxu1  ;;  %v3155_v25 = vadd.f32 %v3154_v9, %v3142_v24 }
 0x229   : > { %v3168_v27 = vadd.f32 %v3167_v17, %v3155_v25 }
 0x22e   : > { %v3180_v19 = vpop.f32.mrf.mxu2  ;;  %v3156_v32 = vpop.f32.mrf.mxu0 }
 0x22f   : > { %v3181_v29 = vadd.f32 %v3180_v19, %v3168_v27  ;;  %v3193_v30 = vpop.f32.mrf.mxu3  ;;  %v3169_v35 = vpop.f32.mrf.mxu1 }
 0x231   : > { %v3194_v36 = vadd.f32 %v3193_v30, %v3181_v29 }
 0x233   : > { %v3199_v28 = vpack.c.bf16 %v3194_v36, %v3090_v1 }
 0x235   : > { %3202 = vst [vmem:[%s5750_s23 + $0x10] sm:$0xff] %v3199_v28 }
 0x236   : > { %v3182_v41 = vpop.f32.mrf.mxu2 }
 0x237   : > { %5467 = shalt.err (!%p5464_p13)
}
 0x238   : > { %5274 = dma.vmem_to_hbm [thread:$0]  (%p5626_p0), %s3220_s25, 384, %s3222_s26, %s3204_s15   ;;  %v3195_v43 = vpop.f32.mrf.mxu3 }
 0x239 PF: > { %s3233_s5 = sand.u32 1, %s5506_s12   ;;  %p5288_p2 = pnand %p3330_p6, %p5633_p5 }
 0x23a   : > { %s3234_s9 = scalar_lea.sflag [#allocation4], %s3233_s5 }
 0x23b   : > { %p5289_p4 = pneg %p5288_p2 }
 0x23d   : > { %5501 = dma.done.wait (%p5289_p4), %s3234_s9, 384  }
 0x23e   : > { %5503 = vsyncadd (%p5289_p4), %s3234_s9, 4294966912  ;;  %s20_s17 = sadd.s32 1, %s5526_s17   ;;  %s5846_s12 = smov %s5510_s13 }
 0x23f   : > { %p17_p7 = scmp.ge.s32.totalorder %s20_s17, 4   ;;  %s5847_s13 = smov %s5514_s14 }
 0x240   : > { %s5848_s14 = smov %s5631_s20  ;;  %s5849_s15 = smov %s5522_s16 }
 0x241   : > { %s5850_s16 = smov %s5852_s6  ;;  %19 = sbr.rel (!%p17_p7) target bundleno = 7 (0x7), region = 85 }
 0x246   :  { %3240 = vsyncpa [#allocation3], 1 }
 0x247   :  { %3242 = vsyncpa [#allocation3 + $0x1], 1 }
 0x248   :  { %3243 = vsyncpa [#allocation6], 1 }
 0x249   :  { %3244 = vsyncpa [#allocation4], 1 }
 0x24a   :  { %3246 = vsyncpa [#allocation4 + $0x1], 1 }

</bundles_post_ra>
